<compile_context>
chip_gen: v6e
topology: v6e:2x2x1
jax: 0.10.0
libtpu: 0.0.40
codegen_flags: <defaults>
</compile_context>

<pallas_src>
import jax
import jax.numpy as jnp
from jax import lax
from jax.experimental import pallas as pl
from jax.experimental.pallas import tpu as pltpu


# ----------------------------------------------------------------------------
# Fused kernel: 3x3 conv (single K=27 matmul over an in-VMEM im2col patch)
#               + folded BN shift + ReLU + global-average-pool accumulation.
# Grid: (N, row_splits, tiles_per_split); ("parallel","parallel","arbitrary").
#   xpad_ref  : (1, Cin, H+2, W+2)   padded NCHW image, resident across (c, m)
#   w_ref     : (Cout, 9*Cin)        conv weights, BN scale folded in
#   shift_ref : (Cout, 1)            folded BN shift (includes conv bias)
#   out_ref   : (1, 1, Cout, 1)      partial pooled SUM for this (n, split)
#   patch_scr : (9*Cin, tile_h*W)    VMEM scratch -- im2col patch matrix
# ----------------------------------------------------------------------------
def _make_fused_kernel(tile_h, tiles_per_split, W, Cin, Cout):
    def kernel(xpad_ref, w_ref, shift_ref, out_ref, patch_scr):
        c = pl.program_id(1)          # row-split (megacore) index
        m = pl.program_id(2)          # row-tile index within this split

        @pl.when(m == 0)
        def _init():
            out_ref[...] = jnp.zeros_like(out_ref)

        # First output row of this tile (== its top padded row for ky == 0).
        row0 = (c * tiles_per_split + m) * tile_h

        # Gather the 3x3xCin im2col patch matrix (9*Cin, tile_h*W) into VMEM
        # scratch.  Each copy is a static-width, lane-dense row segment of the
        # resident padded image block: ky / lh are cheap sublane offsets, kx a
        # small static lane offset.  Every scratch element is overwritten each
        # tile, so no zero-init is required.
        for ky in range(3):
            for kx in range(3):
                for ci in range(Cin):
                    q = (ky * 3 + kx) * Cin + ci
                    for lh in range(tile_h):
                        patch_scr[q:q + 1, lh * W:(lh + 1) * W] = (
                            xpad_ref[0, ci, pl.ds(row0 + lh + ky, 1), kx:kx + W])

        # Single K=27 MXU matmul: (Cout, 9*Cin) @ (9*Cin, tile_h*W).
        feats = jnp.dot(w_ref[...], patch_scr[...],
                        preferred_element_type=jnp.float32)        # (Cout, tile_h*W)

        # Folded-BN shift + ReLU epilogue (scale already folded into weights).
        feats = jnp.maximum(feats + shift_ref[...], 0.0)

        # Partial global-average-pool sum for this row tile, accumulated in
        # the resident output block; /(H*W) and the FC head run in the wrapper.
        part = jnp.sum(feats, axis=1, keepdims=True)                # (Cout, 1)
        out_ref[0, 0] = out_ref[0, 0] + part

    return kernel


# ----------------------------------------------------------------------------
# Exporter.forward equivalent (wrapper: BN folding + pallas_call + FC head)
# ----------------------------------------------------------------------------
def exporter_forward(x_nchw, params, *, tile_h=8, num_row_splits=2):
    N, Cin, H, W = x_nchw.shape
    x_pad = jnp.pad(x_nchw, ((0, 0), (0, 0), (1, 1), (1, 1)))      # (N,Cin,H+2,W+2)

    # Fold eval-mode BatchNorm: scale into the conv weights, shift kept apart.
    eps = 1e-5
    inv_std = lax.rsqrt(params["bn_var"] + eps)
    scale = params["bn_gamma"] * inv_std                                   # (Cout,)
    shift = (params["bn_beta"]
             + (params["conv_b"] - params["bn_mean"]) * scale)[:, None]    # (Cout,1)

    # (Cout, Cin, 3, 3) -> (Cout, ky, kx, ci) -> (Cout, 27), BN scale folded.
    conv_w = params["conv_w"]
    Cout = conv_w.shape[0]
    w27 = jnp.transpose(conv_w, (0, 2, 3, 1)).reshape(Cout, 9 * Cin) * scale[:, None]

    if H % tile_h != 0:
        tile_h = H  # TODO(synk): ragged-H tiling; export heights (224) divide evenly.
    n_tiles = H // tile_h
    splits = num_row_splits if (n_tiles % num_row_splits == 0) else 1
    tiles_per_split = n_tiles // splits

    kernel = _make_fused_kernel(tile_h, tiles_per_split, W, Cin, Cout)

    pooled_parts = pl.pallas_call(
        kernel,
        out_shape=jax.ShapeDtypeStruct((N, splits, Cout, 1), jnp.float32),
        grid_spec=pltpu.PrefetchScalarGridSpec(
            num_scalar_prefetch=0,
            grid=(N, splits, tiles_per_split),
            in_specs=[
                # Padded channel-first image: one batch element resident in
                # VMEM (~0.7 MiB at 224x224), re-fetched only when n changes.
                pl.BlockSpec((1, Cin, H + 2, W + 2), lambda n, c, m: (n, 0, 0, 0)),
                pl.BlockSpec((Cout, 9 * Cin),        lambda n, c, m: (0, 0)),
                pl.BlockSpec((Cout, 1),              lambda n, c, m: (0, 0)),
            ],
            out_specs=pl.BlockSpec((1, 1, Cout, 1), lambda n, c, m: (n, c, 0, 0)),
            scratch_shapes=[pltpu.VMEM((9 * Cin, tile_h * W), jnp.float32)],
        ),
        compiler_params=pltpu.CompilerParams(
            dimension_semantics=("parallel", "parallel", "arbitrary")),
    )(x_pad, w27, shift)

    # Combine per-split partial sums, take the spatial mean, then the
    # classifier head runs in XLA batched across N (kept out of the kernel).
    pooled = pooled_parts.reshape(N, splits, Cout).sum(axis=1) * (1.0 / (H * W))
    return pooled @ params["fc_w"] + params["fc_b"]


# ----------------------------------------------------------------------------
# Pure-JAX reference (for correctness sanity check)
# ----------------------------------------------------------------------------
def reference_forward(x_nchw, params):
    eps = 1e-5
    x_nhwc = jnp.transpose(x_nchw, (0, 2, 3, 1))
    w_hwio = jnp.transpose(params["conv_w"], (2, 3, 1, 0))
    conv = lax.conv_general_dilated(
        x_nhwc, w_hwio, window_strides=(1, 1), padding="SAME",
        dimension_numbers=("NHWC", "HWIO", "NHWC")) + params["conv_b"]
    inv_std = lax.rsqrt(params["bn_var"] + eps)
    bn = (conv - params["bn_mean"]) * inv_std * params["bn_gamma"] + params["bn_beta"]
    relu = jnp.maximum(bn, 0.0)
    pooled = jnp.mean(relu, axis=(1, 2))
    return pooled @ params["fc_w"] + params["fc_b"]


if __name__ == "__main__":
    key = jax.random.PRNGKey(0)
    kx_, kcw, kcb, kg, kb, km, kv, kfw, kfb = jax.random.split(key, 9)

    N, Cin, H, W = 2, 3, 16, 16
    Cout, num_classes = 32, 16

    x = jax.random.normal(kx_, (N, Cin, H, W), jnp.float32)        # NCHW input

    params = {
        "conv_w": 0.1 * jax.random.normal(kcw, (Cout, Cin, 3, 3), jnp.float32),
        "conv_b": 0.1 * jax.random.normal(kcb, (Cout,), jnp.float32),
        "bn_gamma": 1.0 + 0.1 * jax.random.normal(kg, (Cout,), jnp.float32),
        "bn_beta": 0.1 * jax.random.normal(kb, (Cout,), jnp.float32),
        "bn_mean": 0.1 * jax.random.normal(km, (Cout,), jnp.float32),
        "bn_var": 0.5 + jnp.abs(jax.random.normal(kv, (Cout,), jnp.float32)),
        "fc_w": 0.1 * jax.random.normal(kfw, (Cout, num_classes), jnp.float32),
        "fc_b": 0.1 * jax.random.normal(kfb, (num_classes,), jnp.float32),
    }

    # tile_h=4 at H=16 -> 4 row tiles split 2-ways: exercises both the
    # megacore split axis and multi-step pooled accumulation.
    out = jax.block_until_ready(exporter_forward(x, params, tile_h=4))
    ref = jax.block_until_ready(reference_forward(x, params))

    assert out.shape == (N, num_classes)
    assert jnp.allclose(out, ref, rtol=2e-4, atol=2e-4), "Output mismatch"
    print("KERNEL_OK")
</pallas_src>

<mosaic_0001>
module attributes {stable_mosaic.version = 11 : i64} {
  func.func @kernel(%arg0: i32, %arg1: i32, %arg2: i32, %arg3: memref<1x3x18x18xf32, #tpu.memory_space<vmem>>, %arg4: memref<32x27xf32, #tpu.memory_space<vmem>>, %arg5: memref<32x1xf32, #tpu.memory_space<vmem>>, %arg6: memref<1x1x32x1xf32, #tpu.memory_space<vmem>>, %arg7: memref<27x64xf32, #tpu.memory_space<vmem>>) attributes {dimension_semantics = [#tpu.dimension_semantics<parallel>, #tpu.dimension_semantics<parallel>, #tpu.dimension_semantics<arbitrary>], iteration_bounds = array<i64: 2, 2, 2>, scalar_prefetch = 0 : i64, scratch_operands = 1 : i64, tpu.core_type = #tpu.core_type<tc>, window_params = [{transform_indices = @transform_0, window_bounds = array<i64: 1, 3, 18, 18>}, {pipeline_mode = #tpu.pipeline_mode<synchronous>, transform_indices = @transform_1, window_bounds = array<i64: 32, 27>}, {pipeline_mode = #tpu.pipeline_mode<synchronous>, transform_indices = @transform_2, window_bounds = array<i64: 32, 1>}, {transform_indices = @transform_3, window_bounds = array<i64: 1, 1, 32, 1>}]} {
    %c0_i32 = arith.constant 0 : i32
    %0 = arith.cmpi eq, %arg2, %c0_i32 : i32
    %1 = arith.extui %0 : i1 to i32
    %c0_i32_0 = arith.constant 0 : i32
    %2 = arith.cmpi ne, %1, %c0_i32_0 : i32
    scf.if %2 {
      %cst_742 = arith.constant 0.000000e+00 : f32
      %670 = vector.broadcast %cst_742 : f32 to vector<1x1x32x1xf32>
      %c0_743 = arith.constant 0 : index
      %c0_744 = arith.constant 0 : index
      %c0_745 = arith.constant 0 : index
      %c0_746 = arith.constant 0 : index
      %671 = vector.load %arg6[%c0_743, %c0_744, %c0_745, %c0_746] : memref<1x1x32x1xf32, #tpu.memory_space<vmem>>, vector<1x1x32x1xf32>
      tpu.vector_store %arg6[%c0_743, %c0_744, %c0_745, %c0_746], %670 {strides = array<i32>} : memref<1x1x32x1xf32, #tpu.memory_space<vmem>>, vector<1x1x32x1xf32>,
    } else {
    }
    %c2_i32 = arith.constant 2 : i32
    %3 = arith.muli %arg1, %c2_i32 : i32
    %4 = arith.addi %3, %arg2 : i32
    %c4_i32 = arith.constant 4 : i32
    %5 = arith.muli %4, %c4_i32 : i32
    %c0_i32_1 = arith.constant 0 : i32
    %6 = arith.addi %5, %c0_i32_1 : i32
    %c0_i32_2 = arith.constant 0 : i32
    %7 = arith.addi %6, %c0_i32_2 : i32
    %c0 = arith.constant 0 : index
    %c0_3 = arith.constant 0 : index
    %8 = arith.index_cast %7 : i32 to index
    %c0_4 = arith.constant 0 : index
    %9 = vector.load %arg3[%c0, %c0_3, %8, %c0_4] : memref<1x3x18x18xf32, #tpu.memory_space<vmem>>, vector<1x1x1x16xf32>
    %10 = vector.shape_cast %9 : vector<1x1x1x16xf32> to vector<1x16xf32>
    %c0_5 = arith.constant 0 : index
    %c0_6 = arith.constant 0 : index
    %11 = vector.load %arg7[%c0_5, %c0_6] : memref<27x64xf32, #tpu.memory_space<vmem>>, vector<1x16xf32>
    tpu.vector_store %arg7[%c0_5, %c0_6], %10 {strides = array<i32>} : memref<27x64xf32, #tpu.memory_space<vmem>>, vector<1x16xf32>,
    %c1_i32 = arith.constant 1 : i32
    %12 = arith.addi %5, %c1_i32 : i32
    %c0_i32_7 = arith.constant 0 : i32
    %13 = arith.addi %12, %c0_i32_7 : i32
    %c0_8 = arith.constant 0 : index
    %c0_9 = arith.constant 0 : index
    %14 = arith.index_cast %13 : i32 to index
    %c0_10 = arith.constant 0 : index
    %15 = vector.load %arg3[%c0_8, %c0_9, %14, %c0_10] : memref<1x3x18x18xf32, #tpu.memory_space<vmem>>, vector<1x1x1x16xf32>
    %16 = vector.shape_cast %15 : vector<1x1x1x16xf32> to vector<1x16xf32>
    %c0_11 = arith.constant 0 : index
    %c16 = arith.constant 16 : index
    %17 = vector.load %arg7[%c0_11, %c16] : memref<27x64xf32, #tpu.memory_space<vmem>>, vector<1x16xf32>
    tpu.vector_store %arg7[%c0_11, %c16], %16 {strides = array<i32>} : memref<27x64xf32, #tpu.memory_space<vmem>>, vector<1x16xf32>,
    %c2_i32_12 = arith.constant 2 : i32
    %18 = arith.addi %5, %c2_i32_12 : i32
    %c0_i32_13 = arith.constant 0 : i32
    %19 = arith.addi %18, %c0_i32_13 : i32
    %c0_14 = arith.constant 0 : index
    %c0_15 = arith.constant 0 : index
    %20 = arith.index_cast %19 : i32 to index
    %c0_16 = arith.constant 0 : index
    %21 = vector.load %arg3[%c0_14, %c0_15, %20, %c0_16] : memref<1x3x18x18xf32, #tpu.memory_space<vmem>>, vector<1x1x1x16xf32>
    %22 = vector.shape_cast %21 : vector<1x1x1x16xf32> to vector<1x16xf32>
    %c0_17 = arith.constant 0 : index
    %c32 = arith.constant 32 : index
    %23 = vector.load %arg7[%c0_17, %c32] : memref<27x64xf32, #tpu.memory_space<vmem>>, vector<1x16xf32>
    tpu.vector_store %arg7[%c0_17, %c32], %22 {strides = array<i32>} : memref<27x64xf32, #tpu.memory_space<vmem>>, vector<1x16xf32>,
    %c3_i32 = arith.constant 3 : i32
    %24 = arith.addi %5, %c3_i32 : i32
    %c0_i32_18 = arith.constant 0 : i32
    %25 = arith.addi %24, %c0_i32_18 : i32
    %c0_19 = arith.constant 0 : index
    %c0_20 = arith.constant 0 : index
    %26 = arith.index_cast %25 : i32 to index
    %c0_21 = arith.constant 0 : index
    %27 = vector.load %arg3[%c0_19, %c0_20, %26, %c0_21] : memref<1x3x18x18xf32, #tpu.memory_space<vmem>>, vector<1x1x1x16xf32>
    %28 = vector.shape_cast %27 : vector<1x1x1x16xf32> to vector<1x16xf32>
    %c0_22 = arith.constant 0 : index
    %c48 = arith.constant 48 : index
    %29 = vector.load %arg7[%c0_22, %c48] : memref<27x64xf32, #tpu.memory_space<vmem>>, vector<1x16xf32>
    tpu.vector_store %arg7[%c0_22, %c48], %28 {strides = array<i32>} : memref<27x64xf32, #tpu.memory_space<vmem>>, vector<1x16xf32>,
    %c0_i32_23 = arith.constant 0 : i32
    %30 = arith.addi %5, %c0_i32_23 : i32
    %c0_i32_24 = arith.constant 0 : i32
    %31 = arith.addi %30, %c0_i32_24 : i32
    %c0_25 = arith.constant 0 : index
    %c1 = arith.constant 1 : index
    %32 = arith.index_cast %31 : i32 to index
    %c0_26 = arith.constant 0 : index
    %33 = vector.load %arg3[%c0_25, %c1, %32, %c0_26] : memref<1x3x18x18xf32, #tpu.memory_space<vmem>>, vector<1x1x1x16xf32>
    %34 = vector.shape_cast %33 : vector<1x1x1x16xf32> to vector<1x16xf32>
    %c1_27 = arith.constant 1 : index
    %c0_28 = arith.constant 0 : index
    %35 = vector.load %arg7[%c1_27, %c0_28] : memref<27x64xf32, #tpu.memory_space<vmem>>, vector<1x16xf32>
    tpu.vector_store %arg7[%c1_27, %c0_28], %34 {strides = array<i32>} : memref<27x64xf32, #tpu.memory_space<vmem>>, vector<1x16xf32>,
    %c1_i32_29 = arith.constant 1 : i32
    %36 = arith.addi %5, %c1_i32_29 : i32
    %c0_i32_30 = arith.constant 0 : i32
    %37 = arith.addi %36, %c0_i32_30 : i32
    %c0_31 = arith.constant 0 : index
    %c1_32 = arith.constant 1 : index
    %38 = arith.index_cast %37 : i32 to index
    %c0_33 = arith.constant 0 : index
    %39 = vector.load %arg3[%c0_31, %c1_32, %38, %c0_33] : memref<1x3x18x18xf32, #tpu.memory_space<vmem>>, vector<1x1x1x16xf32>
    %40 = vector.shape_cast %39 : vector<1x1x1x16xf32> to vector<1x16xf32>
    %c1_34 = arith.constant 1 : index
    %c16_35 = arith.constant 16 : index
    %41 = vector.load %arg7[%c1_34, %c16_35] : memref<27x64xf32, #tpu.memory_space<vmem>>, vector<1x16xf32>
    tpu.vector_store %arg7[%c1_34, %c16_35], %40 {strides = array<i32>} : memref<27x64xf32, #tpu.memory_space<vmem>>, vector<1x16xf32>,
    %c2_i32_36 = arith.constant 2 : i32
    %42 = arith.addi %5, %c2_i32_36 : i32
    %c0_i32_37 = arith.constant 0 : i32
    %43 = arith.addi %42, %c0_i32_37 : i32
    %c0_38 = arith.constant 0 : index
    %c1_39 = arith.constant 1 : index
    %44 = arith.index_cast %43 : i32 to index
    %c0_40 = arith.constant 0 : index
    %45 = vector.load %arg3[%c0_38, %c1_39, %44, %c0_40] : memref<1x3x18x18xf32, #tpu.memory_space<vmem>>, vector<1x1x1x16xf32>
    %46 = vector.shape_cast %45 : vector<1x1x1x16xf32> to vector<1x16xf32>
    %c1_41 = arith.constant 1 : index
    %c32_42 = arith.constant 32 : index
    %47 = vector.load %arg7[%c1_41, %c32_42] : memref<27x64xf32, #tpu.memory_space<vmem>>, vector<1x16xf32>
    tpu.vector_store %arg7[%c1_41, %c32_42], %46 {strides = array<i32>} : memref<27x64xf32, #tpu.memory_space<vmem>>, vector<1x16xf32>,
    %c3_i32_43 = arith.constant 3 : i32
    %48 = arith.addi %5, %c3_i32_43 : i32
    %c0_i32_44 = arith.constant 0 : i32
    %49 = arith.addi %48, %c0_i32_44 : i32
    %c0_45 = arith.constant 0 : index
    %c1_46 = arith.constant 1 : index
    %50 = arith.index_cast %49 : i32 to index
    %c0_47 = arith.constant 0 : index
    %51 = vector.load %arg3[%c0_45, %c1_46, %50, %c0_47] : memref<1x3x18x18xf32, #tpu.memory_space<vmem>>, vector<1x1x1x16xf32>
    %52 = vector.shape_cast %51 : vector<1x1x1x16xf32> to vector<1x16xf32>
    %c1_48 = arith.constant 1 : index
    %c48_49 = arith.constant 48 : index
    %53 = vector.load %arg7[%c1_48, %c48_49] : memref<27x64xf32, #tpu.memory_space<vmem>>, vector<1x16xf32>
    tpu.vector_store %arg7[%c1_48, %c48_49], %52 {strides = array<i32>} : memref<27x64xf32, #tpu.memory_space<vmem>>, vector<1x16xf32>,
    %c0_i32_50 = arith.constant 0 : i32
    %54 = arith.addi %5, %c0_i32_50 : i32
    %c0_i32_51 = arith.constant 0 : i32
    %55 = arith.addi %54, %c0_i32_51 : i32
    %c0_52 = arith.constant 0 : index
    %c2 = arith.constant 2 : index
    %56 = arith.index_cast %55 : i32 to index
    %c0_53 = arith.constant 0 : index
    %57 = vector.load %arg3[%c0_52, %c2, %56, %c0_53] : memref<1x3x18x18xf32, #tpu.memory_space<vmem>>, vector<1x1x1x16xf32>
    %58 = vector.shape_cast %57 : vector<1x1x1x16xf32> to vector<1x16xf32>
    %c2_54 = arith.constant 2 : index
    %c0_55 = arith.constant 0 : index
    %59 = vector.load %arg7[%c2_54, %c0_55] : memref<27x64xf32, #tpu.memory_space<vmem>>, vector<1x16xf32>
    tpu.vector_store %arg7[%c2_54, %c0_55], %58 {strides = array<i32>} : memref<27x64xf32, #tpu.memory_space<vmem>>, vector<1x16xf32>,
    %c1_i32_56 = arith.constant 1 : i32
    %60 = arith.addi %5, %c1_i32_56 : i32
    %c0_i32_57 = arith.constant 0 : i32
    %61 = arith.addi %60, %c0_i32_57 : i32
    %c0_58 = arith.constant 0 : index
    %c2_59 = arith.constant 2 : index
    %62 = arith.index_cast %61 : i32 to index
    %c0_60 = arith.constant 0 : index
    %63 = vector.load %arg3[%c0_58, %c2_59, %62, %c0_60] : memref<1x3x18x18xf32, #tpu.memory_space<vmem>>, vector<1x1x1x16xf32>
    %64 = vector.shape_cast %63 : vector<1x1x1x16xf32> to vector<1x16xf32>
    %c2_61 = arith.constant 2 : index
    %c16_62 = arith.constant 16 : index
    %65 = vector.load %arg7[%c2_61, %c16_62] : memref<27x64xf32, #tpu.memory_space<vmem>>, vector<1x16xf32>
    tpu.vector_store %arg7[%c2_61, %c16_62], %64 {strides = array<i32>} : memref<27x64xf32, #tpu.memory_space<vmem>>, vector<1x16xf32>,
    %c2_i32_63 = arith.constant 2 : i32
    %66 = arith.addi %5, %c2_i32_63 : i32
    %c0_i32_64 = arith.constant 0 : i32
    %67 = arith.addi %66, %c0_i32_64 : i32
    %c0_65 = arith.constant 0 : index
    %c2_66 = arith.constant 2 : index
    %68 = arith.index_cast %67 : i32 to index
    %c0_67 = arith.constant 0 : index
    %69 = vector.load %arg3[%c0_65, %c2_66, %68, %c0_67] : memref<1x3x18x18xf32, #tpu.memory_space<vmem>>, vector<1x1x1x16xf32>
    %70 = vector.shape_cast %69 : vector<1x1x1x16xf32> to vector<1x16xf32>
    %c2_68 = arith.constant 2 : index
    %c32_69 = arith.constant 32 : index
    %71 = vector.load %arg7[%c2_68, %c32_69] : memref<27x64xf32, #tpu.memory_space<vmem>>, vector<1x16xf32>
    tpu.vector_store %arg7[%c2_68, %c32_69], %70 {strides = array<i32>} : memref<27x64xf32, #tpu.memory_space<vmem>>, vector<1x16xf32>,
    %c3_i32_70 = arith.constant 3 : i32
    %72 = arith.addi %5, %c3_i32_70 : i32
    %c0_i32_71 = arith.constant 0 : i32
    %73 = arith.addi %72, %c0_i32_71 : i32
    %c0_72 = arith.constant 0 : index
    %c2_73 = arith.constant 2 : index
    %74 = arith.index_cast %73 : i32 to index
    %c0_74 = arith.constant 0 : index
    %75 = vector.load %arg3[%c0_72, %c2_73, %74, %c0_74] : memref<1x3x18x18xf32, #tpu.memory_space<vmem>>, vector<1x1x1x16xf32>
    %76 = vector.shape_cast %75 : vector<1x1x1x16xf32> to vector<1x16xf32>
    %c2_75 = arith.constant 2 : index
    %c48_76 = arith.constant 48 : index
    %77 = vector.load %arg7[%c2_75, %c48_76] : memref<27x64xf32, #tpu.memory_space<vmem>>, vector<1x16xf32>
    tpu.vector_store %arg7[%c2_75, %c48_76], %76 {strides = array<i32>} : memref<27x64xf32, #tpu.memory_space<vmem>>, vector<1x16xf32>,
    %c0_i32_77 = arith.constant 0 : i32
    %78 = arith.addi %5, %c0_i32_77 : i32
    %c0_i32_78 = arith.constant 0 : i32
    %79 = arith.addi %78, %c0_i32_78 : i32
    %c0_79 = arith.constant 0 : index
    %c0_80 = arith.constant 0 : index
    %80 = arith.index_cast %79 : i32 to index
    %c1_81 = arith.constant 1 : index
    %81 = vector.load %arg3[%c0_79, %c0_80, %80, %c1_81] : memref<1x3x18x18xf32, #tpu.memory_space<vmem>>, vector<1x1x1x16xf32>
    %82 = vector.shape_cast %81 : vector<1x1x1x16xf32> to vector<1x16xf32>
    %c3 = arith.constant 3 : index
    %c0_82 = arith.constant 0 : index
    %83 = vector.load %arg7[%c3, %c0_82] : memref<27x64xf32, #tpu.memory_space<vmem>>, vector<1x16xf32>
    tpu.vector_store %arg7[%c3, %c0_82], %82 {strides = array<i32>} : memref<27x64xf32, #tpu.memory_space<vmem>>, vector<1x16xf32>,
    %c1_i32_83 = arith.constant 1 : i32
    %84 = arith.addi %5, %c1_i32_83 : i32
    %c0_i32_84 = arith.constant 0 : i32
    %85 = arith.addi %84, %c0_i32_84 : i32
    %c0_85 = arith.constant 0 : index
    %c0_86 = arith.constant 0 : index
    %86 = arith.index_cast %85 : i32 to index
    %c1_87 = arith.constant 1 : index
    %87 = vector.load %arg3[%c0_85, %c0_86, %86, %c1_87] : memref<1x3x18x18xf32, #tpu.memory_space<vmem>>, vector<1x1x1x16xf32>
    %88 = vector.shape_cast %87 : vector<1x1x1x16xf32> to vector<1x16xf32>
    %c3_88 = arith.constant 3 : index
    %c16_89 = arith.constant 16 : index
    %89 = vector.load %arg7[%c3_88, %c16_89] : memref<27x64xf32, #tpu.memory_space<vmem>>, vector<1x16xf32>
    tpu.vector_store %arg7[%c3_88, %c16_89], %88 {strides = array<i32>} : memref<27x64xf32, #tpu.memory_space<vmem>>, vector<1x16xf32>,
    %c2_i32_90 = arith.constant 2 : i32
    %90 = arith.addi %5, %c2_i32_90 : i32
    %c0_i32_91 = arith.constant 0 : i32
    %91 = arith.addi %90, %c0_i32_91 : i32
    %c0_92 = arith.constant 0 : index
    %c0_93 = arith.constant 0 : index
    %92 = arith.index_cast %91 : i32 to index
    %c1_94 = arith.constant 1 : index
    %93 = vector.load %arg3[%c0_92, %c0_93, %92, %c1_94] : memref<1x3x18x18xf32, #tpu.memory_space<vmem>>, vector<1x1x1x16xf32>
    %94 = vector.shape_cast %93 : vector<1x1x1x16xf32> to vector<1x16xf32>
    %c3_95 = arith.constant 3 : index
    %c32_96 = arith.constant 32 : index
    %95 = vector.load %arg7[%c3_95, %c32_96] : memref<27x64xf32, #tpu.memory_space<vmem>>, vector<1x16xf32>
    tpu.vector_store %arg7[%c3_95, %c32_96], %94 {strides = array<i32>} : memref<27x64xf32, #tpu.memory_space<vmem>>, vector<1x16xf32>,
    %c3_i32_97 = arith.constant 3 : i32
    %96 = arith.addi %5, %c3_i32_97 : i32
    %c0_i32_98 = arith.constant 0 : i32
    %97 = arith.addi %96, %c0_i32_98 : i32
    %c0_99 = arith.constant 0 : index
    %c0_100 = arith.constant 0 : index
    %98 = arith.index_cast %97 : i32 to index
    %c1_101 = arith.constant 1 : index
    %99 = vector.load %arg3[%c0_99, %c0_100, %98, %c1_101] : memref<1x3x18x18xf32, #tpu.memory_space<vmem>>, vector<1x1x1x16xf32>
    %100 = vector.shape_cast %99 : vector<1x1x1x16xf32> to vector<1x16xf32>
    %c3_102 = arith.constant 3 : index
    %c48_103 = arith.constant 48 : index
    %101 = vector.load %arg7[%c3_102, %c48_103] : memref<27x64xf32, #tpu.memory_space<vmem>>, vector<1x16xf32>
    tpu.vector_store %arg7[%c3_102, %c48_103], %100 {strides = array<i32>} : memref<27x64xf32, #tpu.memory_space<vmem>>, vector<1x16xf32>,
    %c0_i32_104 = arith.constant 0 : i32
    %102 = arith.addi %5, %c0_i32_104 : i32
    %c0_i32_105 = arith.constant 0 : i32
    %103 = arith.addi %102, %c0_i32_105 : i32
    %c0_106 = arith.constant 0 : index
    %c1_107 = arith.constant 1 : index
    %104 = arith.index_cast %103 : i32 to index
    %c1_108 = arith.constant 1 : index
    %105 = vector.load %arg3[%c0_106, %c1_107, %104, %c1_108] : memref<1x3x18x18xf32, #tpu.memory_space<vmem>>, vector<1x1x1x16xf32>
    %106 = vector.shape_cast %105 : vector<1x1x1x16xf32> to vector<1x16xf32>
    %c4 = arith.constant 4 : index
    %c0_109 = arith.constant 0 : index
    %107 = vector.load %arg7[%c4, %c0_109] : memref<27x64xf32, #tpu.memory_space<vmem>>, vector<1x16xf32>
    tpu.vector_store %arg7[%c4, %c0_109], %106 {strides = array<i32>} : memref<27x64xf32, #tpu.memory_space<vmem>>, vector<1x16xf32>,
    %c1_i32_110 = arith.constant 1 : i32
    %108 = arith.addi %5, %c1_i32_110 : i32
    %c0_i32_111 = arith.constant 0 : i32
    %109 = arith.addi %108, %c0_i32_111 : i32
    %c0_112 = arith.constant 0 : index
    %c1_113 = arith.constant 1 : index
    %110 = arith.index_cast %109 : i32 to index
    %c1_114 = arith.constant 1 : index
    %111 = vector.load %arg3[%c0_112, %c1_113, %110, %c1_114] : memref<1x3x18x18xf32, #tpu.memory_space<vmem>>, vector<1x1x1x16xf32>
    %112 = vector.shape_cast %111 : vector<1x1x1x16xf32> to vector<1x16xf32>
    %c4_115 = arith.constant 4 : index
    %c16_116 = arith.constant 16 : index
    %113 = vector.load %arg7[%c4_115, %c16_116] : memref<27x64xf32, #tpu.memory_space<vmem>>, vector<1x16xf32>
    tpu.vector_store %arg7[%c4_115, %c16_116], %112 {strides = array<i32>} : memref<27x64xf32, #tpu.memory_space<vmem>>, vector<1x16xf32>,
    %c2_i32_117 = arith.constant 2 : i32
    %114 = arith.addi %5, %c2_i32_117 : i32
    %c0_i32_118 = arith.constant 0 : i32
    %115 = arith.addi %114, %c0_i32_118 : i32
    %c0_119 = arith.constant 0 : index
    %c1_120 = arith.constant 1 : index
    %116 = arith.index_cast %115 : i32 to index
    %c1_121 = arith.constant 1 : index
    %117 = vector.load %arg3[%c0_119, %c1_120, %116, %c1_121] : memref<1x3x18x18xf32, #tpu.memory_space<vmem>>, vector<1x1x1x16xf32>
    %118 = vector.shape_cast %117 : vector<1x1x1x16xf32> to vector<1x16xf32>
    %c4_122 = arith.constant 4 : index
    %c32_123 = arith.constant 32 : index
    %119 = vector.load %arg7[%c4_122, %c32_123] : memref<27x64xf32, #tpu.memory_space<vmem>>, vector<1x16xf32>
    tpu.vector_store %arg7[%c4_122, %c32_123], %118 {strides = array<i32>} : memref<27x64xf32, #tpu.memory_space<vmem>>, vector<1x16xf32>,
    %c3_i32_124 = arith.constant 3 : i32
    %120 = arith.addi %5, %c3_i32_124 : i32
    %c0_i32_125 = arith.constant 0 : i32
    %121 = arith.addi %120, %c0_i32_125 : i32
    %c0_126 = arith.constant 0 : index
    %c1_127 = arith.constant 1 : index
    %122 = arith.index_cast %121 : i32 to index
    %c1_128 = arith.constant 1 : index
    %123 = vector.load %arg3[%c0_126, %c1_127, %122, %c1_128] : memref<1x3x18x18xf32, #tpu.memory_space<vmem>>, vector<1x1x1x16xf32>
    %124 = vector.shape_cast %123 : vector<1x1x1x16xf32> to vector<1x16xf32>
    %c4_129 = arith.constant 4 : index
    %c48_130 = arith.constant 48 : index
    %125 = vector.load %arg7[%c4_129, %c48_130] : memref<27x64xf32, #tpu.memory_space<vmem>>, vector<1x16xf32>
    tpu.vector_store %arg7[%c4_129, %c48_130], %124 {strides = array<i32>} : memref<27x64xf32, #tpu.memory_space<vmem>>, vector<1x16xf32>,
    %c0_i32_131 = arith.constant 0 : i32
    %126 = arith.addi %5, %c0_i32_131 : i32
    %c0_i32_132 = arith.constant 0 : i32
    %127 = arith.addi %126, %c0_i32_132 : i32
    %c0_133 = arith.constant 0 : index
    %c2_134 = arith.constant 2 : index
    %128 = arith.index_cast %127 : i32 to index
    %c1_135 = arith.constant 1 : index
    %129 = vector.load %arg3[%c0_133, %c2_134, %128, %c1_135] : memref<1x3x18x18xf32, #tpu.memory_space<vmem>>, vector<1x1x1x16xf32>
    %130 = vector.shape_cast %129 : vector<1x1x1x16xf32> to vector<1x16xf32>
    %c5 = arith.constant 5 : index
    %c0_136 = arith.constant 0 : index
    %131 = vector.load %arg7[%c5, %c0_136] : memref<27x64xf32, #tpu.memory_space<vmem>>, vector<1x16xf32>
    tpu.vector_store %arg7[%c5, %c0_136], %130 {strides = array<i32>} : memref<27x64xf32, #tpu.memory_space<vmem>>, vector<1x16xf32>,
    %c1_i32_137 = arith.constant 1 : i32
    %132 = arith.addi %5, %c1_i32_137 : i32
    %c0_i32_138 = arith.constant 0 : i32
    %133 = arith.addi %132, %c0_i32_138 : i32
    %c0_139 = arith.constant 0 : index
    %c2_140 = arith.constant 2 : index
    %134 = arith.index_cast %133 : i32 to index
    %c1_141 = arith.constant 1 : index
    %135 = vector.load %arg3[%c0_139, %c2_140, %134, %c1_141] : memref<1x3x18x18xf32, #tpu.memory_space<vmem>>, vector<1x1x1x16xf32>
    %136 = vector.shape_cast %135 : vector<1x1x1x16xf32> to vector<1x16xf32>
    %c5_142 = arith.constant 5 : index
    %c16_143 = arith.constant 16 : index
    %137 = vector.load %arg7[%c5_142, %c16_143] : memref<27x64xf32, #tpu.memory_space<vmem>>, vector<1x16xf32>
    tpu.vector_store %arg7[%c5_142, %c16_143], %136 {strides = array<i32>} : memref<27x64xf32, #tpu.memory_space<vmem>>, vector<1x16xf32>,
    %c2_i32_144 = arith.constant 2 : i32
    %138 = arith.addi %5, %c2_i32_144 : i32
    %c0_i32_145 = arith.constant 0 : i32
    %139 = arith.addi %138, %c0_i32_145 : i32
    %c0_146 = arith.constant 0 : index
    %c2_147 = arith.constant 2 : index
    %140 = arith.index_cast %139 : i32 to index
    %c1_148 = arith.constant 1 : index
    %141 = vector.load %arg3[%c0_146, %c2_147, %140, %c1_148] : memref<1x3x18x18xf32, #tpu.memory_space<vmem>>, vector<1x1x1x16xf32>
    %142 = vector.shape_cast %141 : vector<1x1x1x16xf32> to vector<1x16xf32>
    %c5_149 = arith.constant 5 : index
    %c32_150 = arith.constant 32 : index
    %143 = vector.load %arg7[%c5_149, %c32_150] : memref<27x64xf32, #tpu.memory_space<vmem>>, vector<1x16xf32>
    tpu.vector_store %arg7[%c5_149, %c32_150], %142 {strides = array<i32>} : memref<27x64xf32, #tpu.memory_space<vmem>>, vector<1x16xf32>,
    %c3_i32_151 = arith.constant 3 : i32
    %144 = arith.addi %5, %c3_i32_151 : i32
    %c0_i32_152 = arith.constant 0 : i32
    %145 = arith.addi %144, %c0_i32_152 : i32
    %c0_153 = arith.constant 0 : index
    %c2_154 = arith.constant 2 : index
    %146 = arith.index_cast %145 : i32 to index
    %c1_155 = arith.constant 1 : index
    %147 = vector.load %arg3[%c0_153, %c2_154, %146, %c1_155] : memref<1x3x18x18xf32, #tpu.memory_space<vmem>>, vector<1x1x1x16xf32>
    %148 = vector.shape_cast %147 : vector<1x1x1x16xf32> to vector<1x16xf32>
    %c5_156 = arith.constant 5 : index
    %c48_157 = arith.constant 48 : index
    %149 = vector.load %arg7[%c5_156, %c48_157] : memref<27x64xf32, #tpu.memory_space<vmem>>, vector<1x16xf32>
    tpu.vector_store %arg7[%c5_156, %c48_157], %148 {strides = array<i32>} : memref<27x64xf32, #tpu.memory_space<vmem>>, vector<1x16xf32>,
    %c0_i32_158 = arith.constant 0 : i32
    %150 = arith.addi %5, %c0_i32_158 : i32
    %c0_i32_159 = arith.constant 0 : i32
    %151 = arith.addi %150, %c0_i32_159 : i32
    %c0_160 = arith.constant 0 : index
    %c0_161 = arith.constant 0 : index
    %152 = arith.index_cast %151 : i32 to index
    %c2_162 = arith.constant 2 : index
    %153 = vector.load %arg3[%c0_160, %c0_161, %152, %c2_162] : memref<1x3x18x18xf32, #tpu.memory_space<vmem>>, vector<1x1x1x16xf32>
    %154 = vector.shape_cast %153 : vector<1x1x1x16xf32> to vector<1x16xf32>
    %c6 = arith.constant 6 : index
    %c0_163 = arith.constant 0 : index
    %155 = vector.load %arg7[%c6, %c0_163] : memref<27x64xf32, #tpu.memory_space<vmem>>, vector<1x16xf32>
    tpu.vector_store %arg7[%c6, %c0_163], %154 {strides = array<i32>} : memref<27x64xf32, #tpu.memory_space<vmem>>, vector<1x16xf32>,
    %c1_i32_164 = arith.constant 1 : i32
    %156 = arith.addi %5, %c1_i32_164 : i32
    %c0_i32_165 = arith.constant 0 : i32
    %157 = arith.addi %156, %c0_i32_165 : i32
    %c0_166 = arith.constant 0 : index
    %c0_167 = arith.constant 0 : index
    %158 = arith.index_cast %157 : i32 to index
    %c2_168 = arith.constant 2 : index
    %159 = vector.load %arg3[%c0_166, %c0_167, %158, %c2_168] : memref<1x3x18x18xf32, #tpu.memory_space<vmem>>, vector<1x1x1x16xf32>
    %160 = vector.shape_cast %159 : vector<1x1x1x16xf32> to vector<1x16xf32>
    %c6_169 = arith.constant 6 : index
    %c16_170 = arith.constant 16 : index
    %161 = vector.load %arg7[%c6_169, %c16_170] : memref<27x64xf32, #tpu.memory_space<vmem>>, vector<1x16xf32>
    tpu.vector_store %arg7[%c6_169, %c16_170], %160 {strides = array<i32>} : memref<27x64xf32, #tpu.memory_space<vmem>>, vector<1x16xf32>,
    %c2_i32_171 = arith.constant 2 : i32
    %162 = arith.addi %5, %c2_i32_171 : i32
    %c0_i32_172 = arith.constant 0 : i32
    %163 = arith.addi %162, %c0_i32_172 : i32
    %c0_173 = arith.constant 0 : index
    %c0_174 = arith.constant 0 : index
    %164 = arith.index_cast %163 : i32 to index
    %c2_175 = arith.constant 2 : index
    %165 = vector.load %arg3[%c0_173, %c0_174, %164, %c2_175] : memref<1x3x18x18xf32, #tpu.memory_space<vmem>>, vector<1x1x1x16xf32>
    %166 = vector.shape_cast %165 : vector<1x1x1x16xf32> to vector<1x16xf32>
    %c6_176 = arith.constant 6 : index
    %c32_177 = arith.constant 32 : index
    %167 = vector.load %arg7[%c6_176, %c32_177] : memref<27x64xf32, #tpu.memory_space<vmem>>, vector<1x16xf32>
    tpu.vector_store %arg7[%c6_176, %c32_177], %166 {strides = array<i32>} : memref<27x64xf32, #tpu.memory_space<vmem>>, vector<1x16xf32>,
    %c3_i32_178 = arith.constant 3 : i32
    %168 = arith.addi %5, %c3_i32_178 : i32
    %c0_i32_179 = arith.constant 0 : i32
    %169 = arith.addi %168, %c0_i32_179 : i32
    %c0_180 = arith.constant 0 : index
    %c0_181 = arith.constant 0 : index
    %170 = arith.index_cast %169 : i32 to index
    %c2_182 = arith.constant 2 : index
    %171 = vector.load %arg3[%c0_180, %c0_181, %170, %c2_182] : memref<1x3x18x18xf32, #tpu.memory_space<vmem>>, vector<1x1x1x16xf32>
    %172 = vector.shape_cast %171 : vector<1x1x1x16xf32> to vector<1x16xf32>
    %c6_183 = arith.constant 6 : index
    %c48_184 = arith.constant 48 : index
    %173 = vector.load %arg7[%c6_183, %c48_184] : memref<27x64xf32, #tpu.memory_space<vmem>>, vector<1x16xf32>
    tpu.vector_store %arg7[%c6_183, %c48_184], %172 {strides = array<i32>} : memref<27x64xf32, #tpu.memory_space<vmem>>, vector<1x16xf32>,
    %c0_i32_185 = arith.constant 0 : i32
    %174 = arith.addi %5, %c0_i32_185 : i32
    %c0_i32_186 = arith.constant 0 : i32
    %175 = arith.addi %174, %c0_i32_186 : i32
    %c0_187 = arith.constant 0 : index
    %c1_188 = arith.constant 1 : index
    %176 = arith.index_cast %175 : i32 to index
    %c2_189 = arith.constant 2 : index
    %177 = vector.load %arg3[%c0_187, %c1_188, %176, %c2_189] : memref<1x3x18x18xf32, #tpu.memory_space<vmem>>, vector<1x1x1x16xf32>
    %178 = vector.shape_cast %177 : vector<1x1x1x16xf32> to vector<1x16xf32>
    %c7 = arith.constant 7 : index
    %c0_190 = arith.constant 0 : index
    %179 = vector.load %arg7[%c7, %c0_190] : memref<27x64xf32, #tpu.memory_space<vmem>>, vector<1x16xf32>
    tpu.vector_store %arg7[%c7, %c0_190], %178 {strides = array<i32>} : memref<27x64xf32, #tpu.memory_space<vmem>>, vector<1x16xf32>,
    %c1_i32_191 = arith.constant 1 : i32
    %180 = arith.addi %5, %c1_i32_191 : i32
    %c0_i32_192 = arith.constant 0 : i32
    %181 = arith.addi %180, %c0_i32_192 : i32
    %c0_193 = arith.constant 0 : index
    %c1_194 = arith.constant 1 : index
    %182 = arith.index_cast %181 : i32 to index
    %c2_195 = arith.constant 2 : index
    %183 = vector.load %arg3[%c0_193, %c1_194, %182, %c2_195] : memref<1x3x18x18xf32, #tpu.memory_space<vmem>>, vector<1x1x1x16xf32>
    %184 = vector.shape_cast %183 : vector<1x1x1x16xf32> to vector<1x16xf32>
    %c7_196 = arith.constant 7 : index
    %c16_197 = arith.constant 16 : index
    %185 = vector.load %arg7[%c7_196, %c16_197] : memref<27x64xf32, #tpu.memory_space<vmem>>, vector<1x16xf32>
    tpu.vector_store %arg7[%c7_196, %c16_197], %184 {strides = array<i32>} : memref<27x64xf32, #tpu.memory_space<vmem>>, vector<1x16xf32>,
    %c2_i32_198 = arith.constant 2 : i32
    %186 = arith.addi %5, %c2_i32_198 : i32
    %c0_i32_199 = arith.constant 0 : i32
    %187 = arith.addi %186, %c0_i32_199 : i32
    %c0_200 = arith.constant 0 : index
    %c1_201 = arith.constant 1 : index
    %188 = arith.index_cast %187 : i32 to index
    %c2_202 = arith.constant 2 : index
    %189 = vector.load %arg3[%c0_200, %c1_201, %188, %c2_202] : memref<1x3x18x18xf32, #tpu.memory_space<vmem>>, vector<1x1x1x16xf32>
    %190 = vector.shape_cast %189 : vector<1x1x1x16xf32> to vector<1x16xf32>
    %c7_203 = arith.constant 7 : index
    %c32_204 = arith.constant 32 : index
    %191 = vector.load %arg7[%c7_203, %c32_204] : memref<27x64xf32, #tpu.memory_space<vmem>>, vector<1x16xf32>
    tpu.vector_store %arg7[%c7_203, %c32_204], %190 {strides = array<i32>} : memref<27x64xf32, #tpu.memory_space<vmem>>, vector<1x16xf32>,
    %c3_i32_205 = arith.constant 3 : i32
    %192 = arith.addi %5, %c3_i32_205 : i32
    %c0_i32_206 = arith.constant 0 : i32
    %193 = arith.addi %192, %c0_i32_206 : i32
    %c0_207 = arith.constant 0 : index
    %c1_208 = arith.constant 1 : index
    %194 = arith.index_cast %193 : i32 to index
    %c2_209 = arith.constant 2 : index
    %195 = vector.load %arg3[%c0_207, %c1_208, %194, %c2_209] : memref<1x3x18x18xf32, #tpu.memory_space<vmem>>, vector<1x1x1x16xf32>
    %196 = vector.shape_cast %195 : vector<1x1x1x16xf32> to vector<1x16xf32>
    %c7_210 = arith.constant 7 : index
    %c48_211 = arith.constant 48 : index
    %197 = vector.load %arg7[%c7_210, %c48_211] : memref<27x64xf32, #tpu.memory_space<vmem>>, vector<1x16xf32>
    tpu.vector_store %arg7[%c7_210, %c48_211], %196 {strides = array<i32>} : memref<27x64xf32, #tpu.memory_space<vmem>>, vector<1x16xf32>,
    %c0_i32_212 = arith.constant 0 : i32
    %198 = arith.addi %5, %c0_i32_212 : i32
    %c0_i32_213 = arith.constant 0 : i32
    %199 = arith.addi %198, %c0_i32_213 : i32
    %c0_214 = arith.constant 0 : index
    %c2_215 = arith.constant 2 : index
    %200 = arith.index_cast %199 : i32 to index
    %c2_216 = arith.constant 2 : index
    %201 = vector.load %arg3[%c0_214, %c2_215, %200, %c2_216] : memref<1x3x18x18xf32, #tpu.memory_space<vmem>>, vector<1x1x1x16xf32>
    %202 = vector.shape_cast %201 : vector<1x1x1x16xf32> to vector<1x16xf32>
    %c8 = arith.constant 8 : index
    %c0_217 = arith.constant 0 : index
    %203 = vector.load %arg7[%c8, %c0_217] : memref<27x64xf32, #tpu.memory_space<vmem>>, vector<1x16xf32>
    tpu.vector_store %arg7[%c8, %c0_217], %202 {strides = array<i32>} : memref<27x64xf32, #tpu.memory_space<vmem>>, vector<1x16xf32>,
    %c1_i32_218 = arith.constant 1 : i32
    %204 = arith.addi %5, %c1_i32_218 : i32
    %c0_i32_219 = arith.constant 0 : i32
    %205 = arith.addi %204, %c0_i32_219 : i32
    %c0_220 = arith.constant 0 : index
    %c2_221 = arith.constant 2 : index
    %206 = arith.index_cast %205 : i32 to index
    %c2_222 = arith.constant 2 : index
    %207 = vector.load %arg3[%c0_220, %c2_221, %206, %c2_222] : memref<1x3x18x18xf32, #tpu.memory_space<vmem>>, vector<1x1x1x16xf32>
    %208 = vector.shape_cast %207 : vector<1x1x1x16xf32> to vector<1x16xf32>
    %c8_223 = arith.constant 8 : index
    %c16_224 = arith.constant 16 : index
    %209 = vector.load %arg7[%c8_223, %c16_224] : memref<27x64xf32, #tpu.memory_space<vmem>>, vector<1x16xf32>
    tpu.vector_store %arg7[%c8_223, %c16_224], %208 {strides = array<i32>} : memref<27x64xf32, #tpu.memory_space<vmem>>, vector<1x16xf32>,
    %c2_i32_225 = arith.constant 2 : i32
    %210 = arith.addi %5, %c2_i32_225 : i32
    %c0_i32_226 = arith.constant 0 : i32
    %211 = arith.addi %210, %c0_i32_226 : i32
    %c0_227 = arith.constant 0 : index
    %c2_228 = arith.constant 2 : index
    %212 = arith.index_cast %211 : i32 to index
    %c2_229 = arith.constant 2 : index
    %213 = vector.load %arg3[%c0_227, %c2_228, %212, %c2_229] : memref<1x3x18x18xf32, #tpu.memory_space<vmem>>, vector<1x1x1x16xf32>
    %214 = vector.shape_cast %213 : vector<1x1x1x16xf32> to vector<1x16xf32>
    %c8_230 = arith.constant 8 : index
    %c32_231 = arith.constant 32 : index
    %215 = vector.load %arg7[%c8_230, %c32_231] : memref<27x64xf32, #tpu.memory_space<vmem>>, vector<1x16xf32>
    tpu.vector_store %arg7[%c8_230, %c32_231], %214 {strides = array<i32>} : memref<27x64xf32, #tpu.memory_space<vmem>>, vector<1x16xf32>,
    %c3_i32_232 = arith.constant 3 : i32
    %216 = arith.addi %5, %c3_i32_232 : i32
    %c0_i32_233 = arith.constant 0 : i32
    %217 = arith.addi %216, %c0_i32_233 : i32
    %c0_234 = arith.constant 0 : index
    %c2_235 = arith.constant 2 : index
    %218 = arith.index_cast %217 : i32 to index
    %c2_236 = arith.constant 2 : index
    %219 = vector.load %arg3[%c0_234, %c2_235, %218, %c2_236] : memref<1x3x18x18xf32, #tpu.memory_space<vmem>>, vector<1x1x1x16xf32>
    %220 = vector.shape_cast %219 : vector<1x1x1x16xf32> to vector<1x16xf32>
    %c8_237 = arith.constant 8 : index
    %c48_238 = arith.constant 48 : index
    %221 = vector.load %arg7[%c8_237, %c48_238] : memref<27x64xf32, #tpu.memory_space<vmem>>, vector<1x16xf32>
    tpu.vector_store %arg7[%c8_237, %c48_238], %220 {strides = array<i32>} : memref<27x64xf32, #tpu.memory_space<vmem>>, vector<1x16xf32>,
    %c0_i32_239 = arith.constant 0 : i32
    %222 = arith.addi %5, %c0_i32_239 : i32
    %c1_i32_240 = arith.constant 1 : i32
    %223 = arith.addi %222, %c1_i32_240 : i32
    %c0_241 = arith.constant 0 : index
    %c0_242 = arith.constant 0 : index
    %224 = arith.index_cast %223 : i32 to index
    %c0_243 = arith.constant 0 : index
    %225 = vector.load %arg3[%c0_241, %c0_242, %224, %c0_243] : memref<1x3x18x18xf32, #tpu.memory_space<vmem>>, vector<1x1x1x16xf32>
    %226 = vector.shape_cast %225 : vector<1x1x1x16xf32> to vector<1x16xf32>
    %c9 = arith.constant 9 : index
    %c0_244 = arith.constant 0 : index
    %227 = vector.load %arg7[%c9, %c0_244] : memref<27x64xf32, #tpu.memory_space<vmem>>, vector<1x16xf32>
    tpu.vector_store %arg7[%c9, %c0_244], %226 {strides = array<i32>} : memref<27x64xf32, #tpu.memory_space<vmem>>, vector<1x16xf32>,
    %c1_i32_245 = arith.constant 1 : i32
    %228 = arith.addi %5, %c1_i32_245 : i32
    %c1_i32_246 = arith.constant 1 : i32
    %229 = arith.addi %228, %c1_i32_246 : i32
    %c0_247 = arith.constant 0 : index
    %c0_248 = arith.constant 0 : index
    %230 = arith.index_cast %229 : i32 to index
    %c0_249 = arith.constant 0 : index
    %231 = vector.load %arg3[%c0_247, %c0_248, %230, %c0_249] : memref<1x3x18x18xf32, #tpu.memory_space<vmem>>, vector<1x1x1x16xf32>
    %232 = vector.shape_cast %231 : vector<1x1x1x16xf32> to vector<1x16xf32>
    %c9_250 = arith.constant 9 : index
    %c16_251 = arith.constant 16 : index
    %233 = vector.load %arg7[%c9_250, %c16_251] : memref<27x64xf32, #tpu.memory_space<vmem>>, vector<1x16xf32>
    tpu.vector_store %arg7[%c9_250, %c16_251], %232 {strides = array<i32>} : memref<27x64xf32, #tpu.memory_space<vmem>>, vector<1x16xf32>,
    %c2_i32_252 = arith.constant 2 : i32
    %234 = arith.addi %5, %c2_i32_252 : i32
    %c1_i32_253 = arith.constant 1 : i32
    %235 = arith.addi %234, %c1_i32_253 : i32
    %c0_254 = arith.constant 0 : index
    %c0_255 = arith.constant 0 : index
    %236 = arith.index_cast %235 : i32 to index
    %c0_256 = arith.constant 0 : index
    %237 = vector.load %arg3[%c0_254, %c0_255, %236, %c0_256] : memref<1x3x18x18xf32, #tpu.memory_space<vmem>>, vector<1x1x1x16xf32>
    %238 = vector.shape_cast %237 : vector<1x1x1x16xf32> to vector<1x16xf32>
    %c9_257 = arith.constant 9 : index
    %c32_258 = arith.constant 32 : index
    %239 = vector.load %arg7[%c9_257, %c32_258] : memref<27x64xf32, #tpu.memory_space<vmem>>, vector<1x16xf32>
    tpu.vector_store %arg7[%c9_257, %c32_258], %238 {strides = array<i32>} : memref<27x64xf32, #tpu.memory_space<vmem>>, vector<1x16xf32>,
    %c3_i32_259 = arith.constant 3 : i32
    %240 = arith.addi %5, %c3_i32_259 : i32
    %c1_i32_260 = arith.constant 1 : i32
    %241 = arith.addi %240, %c1_i32_260 : i32
    %c0_261 = arith.constant 0 : index
    %c0_262 = arith.constant 0 : index
    %242 = arith.index_cast %241 : i32 to index
    %c0_263 = arith.constant 0 : index
    %243 = vector.load %arg3[%c0_261, %c0_262, %242, %c0_263] : memref<1x3x18x18xf32, #tpu.memory_space<vmem>>, vector<1x1x1x16xf32>
    %244 = vector.shape_cast %243 : vector<1x1x1x16xf32> to vector<1x16xf32>
    %c9_264 = arith.constant 9 : index
    %c48_265 = arith.constant 48 : index
    %245 = vector.load %arg7[%c9_264, %c48_265] : memref<27x64xf32, #tpu.memory_space<vmem>>, vector<1x16xf32>
    tpu.vector_store %arg7[%c9_264, %c48_265], %244 {strides = array<i32>} : memref<27x64xf32, #tpu.memory_space<vmem>>, vector<1x16xf32>,
    %c0_i32_266 = arith.constant 0 : i32
    %246 = arith.addi %5, %c0_i32_266 : i32
    %c1_i32_267 = arith.constant 1 : i32
    %247 = arith.addi %246, %c1_i32_267 : i32
    %c0_268 = arith.constant 0 : index
    %c1_269 = arith.constant 1 : index
    %248 = arith.index_cast %247 : i32 to index
    %c0_270 = arith.constant 0 : index
    %249 = vector.load %arg3[%c0_268, %c1_269, %248, %c0_270] : memref<1x3x18x18xf32, #tpu.memory_space<vmem>>, vector<1x1x1x16xf32>
    %250 = vector.shape_cast %249 : vector<1x1x1x16xf32> to vector<1x16xf32>
    %c10 = arith.constant 10 : index
    %c0_271 = arith.constant 0 : index
    %251 = vector.load %arg7[%c10, %c0_271] : memref<27x64xf32, #tpu.memory_space<vmem>>, vector<1x16xf32>
    tpu.vector_store %arg7[%c10, %c0_271], %250 {strides = array<i32>} : memref<27x64xf32, #tpu.memory_space<vmem>>, vector<1x16xf32>,
    %c1_i32_272 = arith.constant 1 : i32
    %252 = arith.addi %5, %c1_i32_272 : i32
    %c1_i32_273 = arith.constant 1 : i32
    %253 = arith.addi %252, %c1_i32_273 : i32
    %c0_274 = arith.constant 0 : index
    %c1_275 = arith.constant 1 : index
    %254 = arith.index_cast %253 : i32 to index
    %c0_276 = arith.constant 0 : index
    %255 = vector.load %arg3[%c0_274, %c1_275, %254, %c0_276] : memref<1x3x18x18xf32, #tpu.memory_space<vmem>>, vector<1x1x1x16xf32>
    %256 = vector.shape_cast %255 : vector<1x1x1x16xf32> to vector<1x16xf32>
    %c10_277 = arith.constant 10 : index
    %c16_278 = arith.constant 16 : index
    %257 = vector.load %arg7[%c10_277, %c16_278] : memref<27x64xf32, #tpu.memory_space<vmem>>, vector<1x16xf32>
    tpu.vector_store %arg7[%c10_277, %c16_278], %256 {strides = array<i32>} : memref<27x64xf32, #tpu.memory_space<vmem>>, vector<1x16xf32>,
    %c2_i32_279 = arith.constant 2 : i32
    %258 = arith.addi %5, %c2_i32_279 : i32
    %c1_i32_280 = arith.constant 1 : i32
    %259 = arith.addi %258, %c1_i32_280 : i32
    %c0_281 = arith.constant 0 : index
    %c1_282 = arith.constant 1 : index
    %260 = arith.index_cast %259 : i32 to index
    %c0_283 = arith.constant 0 : index
    %261 = vector.load %arg3[%c0_281, %c1_282, %260, %c0_283] : memref<1x3x18x18xf32, #tpu.memory_space<vmem>>, vector<1x1x1x16xf32>
    %262 = vector.shape_cast %261 : vector<1x1x1x16xf32> to vector<1x16xf32>
    %c10_284 = arith.constant 10 : index
    %c32_285 = arith.constant 32 : index
    %263 = vector.load %arg7[%c10_284, %c32_285] : memref<27x64xf32, #tpu.memory_space<vmem>>, vector<1x16xf32>
    tpu.vector_store %arg7[%c10_284, %c32_285], %262 {strides = array<i32>} : memref<27x64xf32, #tpu.memory_space<vmem>>, vector<1x16xf32>,
    %c3_i32_286 = arith.constant 3 : i32
    %264 = arith.addi %5, %c3_i32_286 : i32
    %c1_i32_287 = arith.constant 1 : i32
    %265 = arith.addi %264, %c1_i32_287 : i32
    %c0_288 = arith.constant 0 : index
    %c1_289 = arith.constant 1 : index
    %266 = arith.index_cast %265 : i32 to index
    %c0_290 = arith.constant 0 : index
    %267 = vector.load %arg3[%c0_288, %c1_289, %266, %c0_290] : memref<1x3x18x18xf32, #tpu.memory_space<vmem>>, vector<1x1x1x16xf32>
    %268 = vector.shape_cast %267 : vector<1x1x1x16xf32> to vector<1x16xf32>
    %c10_291 = arith.constant 10 : index
    %c48_292 = arith.constant 48 : index
    %269 = vector.load %arg7[%c10_291, %c48_292] : memref<27x64xf32, #tpu.memory_space<vmem>>, vector<1x16xf32>
    tpu.vector_store %arg7[%c10_291, %c48_292], %268 {strides = array<i32>} : memref<27x64xf32, #tpu.memory_space<vmem>>, vector<1x16xf32>,
    %c0_i32_293 = arith.constant 0 : i32
    %270 = arith.addi %5, %c0_i32_293 : i32
    %c1_i32_294 = arith.constant 1 : i32
    %271 = arith.addi %270, %c1_i32_294 : i32
    %c0_295 = arith.constant 0 : index
    %c2_296 = arith.constant 2 : index
    %272 = arith.index_cast %271 : i32 to index
    %c0_297 = arith.constant 0 : index
    %273 = vector.load %arg3[%c0_295, %c2_296, %272, %c0_297] : memref<1x3x18x18xf32, #tpu.memory_space<vmem>>, vector<1x1x1x16xf32>
    %274 = vector.shape_cast %273 : vector<1x1x1x16xf32> to vector<1x16xf32>
    %c11 = arith.constant 11 : index
    %c0_298 = arith.constant 0 : index
    %275 = vector.load %arg7[%c11, %c0_298] : memref<27x64xf32, #tpu.memory_space<vmem>>, vector<1x16xf32>
    tpu.vector_store %arg7[%c11, %c0_298], %274 {strides = array<i32>} : memref<27x64xf32, #tpu.memory_space<vmem>>, vector<1x16xf32>,
    %c1_i32_299 = arith.constant 1 : i32
    %276 = arith.addi %5, %c1_i32_299 : i32
    %c1_i32_300 = arith.constant 1 : i32
    %277 = arith.addi %276, %c1_i32_300 : i32
    %c0_301 = arith.constant 0 : index
    %c2_302 = arith.constant 2 : index
    %278 = arith.index_cast %277 : i32 to index
    %c0_303 = arith.constant 0 : index
    %279 = vector.load %arg3[%c0_301, %c2_302, %278, %c0_303] : memref<1x3x18x18xf32, #tpu.memory_space<vmem>>, vector<1x1x1x16xf32>
    %280 = vector.shape_cast %279 : vector<1x1x1x16xf32> to vector<1x16xf32>
    %c11_304 = arith.constant 11 : index
    %c16_305 = arith.constant 16 : index
    %281 = vector.load %arg7[%c11_304, %c16_305] : memref<27x64xf32, #tpu.memory_space<vmem>>, vector<1x16xf32>
    tpu.vector_store %arg7[%c11_304, %c16_305], %280 {strides = array<i32>} : memref<27x64xf32, #tpu.memory_space<vmem>>, vector<1x16xf32>,
    %c2_i32_306 = arith.constant 2 : i32
    %282 = arith.addi %5, %c2_i32_306 : i32
    %c1_i32_307 = arith.constant 1 : i32
    %283 = arith.addi %282, %c1_i32_307 : i32
    %c0_308 = arith.constant 0 : index
    %c2_309 = arith.constant 2 : index
    %284 = arith.index_cast %283 : i32 to index
    %c0_310 = arith.constant 0 : index
    %285 = vector.load %arg3[%c0_308, %c2_309, %284, %c0_310] : memref<1x3x18x18xf32, #tpu.memory_space<vmem>>, vector<1x1x1x16xf32>
    %286 = vector.shape_cast %285 : vector<1x1x1x16xf32> to vector<1x16xf32>
    %c11_311 = arith.constant 11 : index
    %c32_312 = arith.constant 32 : index
    %287 = vector.load %arg7[%c11_311, %c32_312] : memref<27x64xf32, #tpu.memory_space<vmem>>, vector<1x16xf32>
    tpu.vector_store %arg7[%c11_311, %c32_312], %286 {strides = array<i32>} : memref<27x64xf32, #tpu.memory_space<vmem>>, vector<1x16xf32>,
    %c3_i32_313 = arith.constant 3 : i32
    %288 = arith.addi %5, %c3_i32_313 : i32
    %c1_i32_314 = arith.constant 1 : i32
    %289 = arith.addi %288, %c1_i32_314 : i32
    %c0_315 = arith.constant 0 : index
    %c2_316 = arith.constant 2 : index
    %290 = arith.index_cast %289 : i32 to index
    %c0_317 = arith.constant 0 : index
    %291 = vector.load %arg3[%c0_315, %c2_316, %290, %c0_317] : memref<1x3x18x18xf32, #tpu.memory_space<vmem>>, vector<1x1x1x16xf32>
    %292 = vector.shape_cast %291 : vector<1x1x1x16xf32> to vector<1x16xf32>
    %c11_318 = arith.constant 11 : index
    %c48_319 = arith.constant 48 : index
    %293 = vector.load %arg7[%c11_318, %c48_319] : memref<27x64xf32, #tpu.memory_space<vmem>>, vector<1x16xf32>
    tpu.vector_store %arg7[%c11_318, %c48_319], %292 {strides = array<i32>} : memref<27x64xf32, #tpu.memory_space<vmem>>, vector<1x16xf32>,
    %c0_i32_320 = arith.constant 0 : i32
    %294 = arith.addi %5, %c0_i32_320 : i32
    %c1_i32_321 = arith.constant 1 : i32
    %295 = arith.addi %294, %c1_i32_321 : i32
    %c0_322 = arith.constant 0 : index
    %c0_323 = arith.constant 0 : index
    %296 = arith.index_cast %295 : i32 to index
    %c1_324 = arith.constant 1 : index
    %297 = vector.load %arg3[%c0_322, %c0_323, %296, %c1_324] : memref<1x3x18x18xf32, #tpu.memory_space<vmem>>, vector<1x1x1x16xf32>
    %298 = vector.shape_cast %297 : vector<1x1x1x16xf32> to vector<1x16xf32>
    %c12 = arith.constant 12 : index
    %c0_325 = arith.constant 0 : index
    %299 = vector.load %arg7[%c12, %c0_325] : memref<27x64xf32, #tpu.memory_space<vmem>>, vector<1x16xf32>
    tpu.vector_store %arg7[%c12, %c0_325], %298 {strides = array<i32>} : memref<27x64xf32, #tpu.memory_space<vmem>>, vector<1x16xf32>,
    %c1_i32_326 = arith.constant 1 : i32
    %300 = arith.addi %5, %c1_i32_326 : i32
    %c1_i32_327 = arith.constant 1 : i32
    %301 = arith.addi %300, %c1_i32_327 : i32
    %c0_328 = arith.constant 0 : index
    %c0_329 = arith.constant 0 : index
    %302 = arith.index_cast %301 : i32 to index
    %c1_330 = arith.constant 1 : index
    %303 = vector.load %arg3[%c0_328, %c0_329, %302, %c1_330] : memref<1x3x18x18xf32, #tpu.memory_space<vmem>>, vector<1x1x1x16xf32>
    %304 = vector.shape_cast %303 : vector<1x1x1x16xf32> to vector<1x16xf32>
    %c12_331 = arith.constant 12 : index
    %c16_332 = arith.constant 16 : index
    %305 = vector.load %arg7[%c12_331, %c16_332] : memref<27x64xf32, #tpu.memory_space<vmem>>, vector<1x16xf32>
    tpu.vector_store %arg7[%c12_331, %c16_332], %304 {strides = array<i32>} : memref<27x64xf32, #tpu.memory_space<vmem>>, vector<1x16xf32>,
    %c2_i32_333 = arith.constant 2 : i32
    %306 = arith.addi %5, %c2_i32_333 : i32
    %c1_i32_334 = arith.constant 1 : i32
    %307 = arith.addi %306, %c1_i32_334 : i32
    %c0_335 = arith.constant 0 : index
    %c0_336 = arith.constant 0 : index
    %308 = arith.index_cast %307 : i32 to index
    %c1_337 = arith.constant 1 : index
    %309 = vector.load %arg3[%c0_335, %c0_336, %308, %c1_337] : memref<1x3x18x18xf32, #tpu.memory_space<vmem>>, vector<1x1x1x16xf32>
    %310 = vector.shape_cast %309 : vector<1x1x1x16xf32> to vector<1x16xf32>
    %c12_338 = arith.constant 12 : index
    %c32_339 = arith.constant 32 : index
    %311 = vector.load %arg7[%c12_338, %c32_339] : memref<27x64xf32, #tpu.memory_space<vmem>>, vector<1x16xf32>
    tpu.vector_store %arg7[%c12_338, %c32_339], %310 {strides = array<i32>} : memref<27x64xf32, #tpu.memory_space<vmem>>, vector<1x16xf32>,
    %c3_i32_340 = arith.constant 3 : i32
    %312 = arith.addi %5, %c3_i32_340 : i32
    %c1_i32_341 = arith.constant 1 : i32
    %313 = arith.addi %312, %c1_i32_341 : i32
    %c0_342 = arith.constant 0 : index
    %c0_343 = arith.constant 0 : index
    %314 = arith.index_cast %313 : i32 to index
    %c1_344 = arith.constant 1 : index
    %315 = vector.load %arg3[%c0_342, %c0_343, %314, %c1_344] : memref<1x3x18x18xf32, #tpu.memory_space<vmem>>, vector<1x1x1x16xf32>
    %316 = vector.shape_cast %315 : vector<1x1x1x16xf32> to vector<1x16xf32>
    %c12_345 = arith.constant 12 : index
    %c48_346 = arith.constant 48 : index
    %317 = vector.load %arg7[%c12_345, %c48_346] : memref<27x64xf32, #tpu.memory_space<vmem>>, vector<1x16xf32>
    tpu.vector_store %arg7[%c12_345, %c48_346], %316 {strides = array<i32>} : memref<27x64xf32, #tpu.memory_space<vmem>>, vector<1x16xf32>,
    %c0_i32_347 = arith.constant 0 : i32
    %318 = arith.addi %5, %c0_i32_347 : i32
    %c1_i32_348 = arith.constant 1 : i32
    %319 = arith.addi %318, %c1_i32_348 : i32
    %c0_349 = arith.constant 0 : index
    %c1_350 = arith.constant 1 : index
    %320 = arith.index_cast %319 : i32 to index
    %c1_351 = arith.constant 1 : index
    %321 = vector.load %arg3[%c0_349, %c1_350, %320, %c1_351] : memref<1x3x18x18xf32, #tpu.memory_space<vmem>>, vector<1x1x1x16xf32>
    %322 = vector.shape_cast %321 : vector<1x1x1x16xf32> to vector<1x16xf32>
    %c13 = arith.constant 13 : index
    %c0_352 = arith.constant 0 : index
    %323 = vector.load %arg7[%c13, %c0_352] : memref<27x64xf32, #tpu.memory_space<vmem>>, vector<1x16xf32>
    tpu.vector_store %arg7[%c13, %c0_352], %322 {strides = array<i32>} : memref<27x64xf32, #tpu.memory_space<vmem>>, vector<1x16xf32>,
    %c1_i32_353 = arith.constant 1 : i32
    %324 = arith.addi %5, %c1_i32_353 : i32
    %c1_i32_354 = arith.constant 1 : i32
    %325 = arith.addi %324, %c1_i32_354 : i32
    %c0_355 = arith.constant 0 : index
    %c1_356 = arith.constant 1 : index
    %326 = arith.index_cast %325 : i32 to index
    %c1_357 = arith.constant 1 : index
    %327 = vector.load %arg3[%c0_355, %c1_356, %326, %c1_357] : memref<1x3x18x18xf32, #tpu.memory_space<vmem>>, vector<1x1x1x16xf32>
    %328 = vector.shape_cast %327 : vector<1x1x1x16xf32> to vector<1x16xf32>
    %c13_358 = arith.constant 13 : index
    %c16_359 = arith.constant 16 : index
    %329 = vector.load %arg7[%c13_358, %c16_359] : memref<27x64xf32, #tpu.memory_space<vmem>>, vector<1x16xf32>
    tpu.vector_store %arg7[%c13_358, %c16_359], %328 {strides = array<i32>} : memref<27x64xf32, #tpu.memory_space<vmem>>, vector<1x16xf32>,
    %c2_i32_360 = arith.constant 2 : i32
    %330 = arith.addi %5, %c2_i32_360 : i32
    %c1_i32_361 = arith.constant 1 : i32
    %331 = arith.addi %330, %c1_i32_361 : i32
    %c0_362 = arith.constant 0 : index
    %c1_363 = arith.constant 1 : index
    %332 = arith.index_cast %331 : i32 to index
    %c1_364 = arith.constant 1 : index
    %333 = vector.load %arg3[%c0_362, %c1_363, %332, %c1_364] : memref<1x3x18x18xf32, #tpu.memory_space<vmem>>, vector<1x1x1x16xf32>
    %334 = vector.shape_cast %333 : vector<1x1x1x16xf32> to vector<1x16xf32>
    %c13_365 = arith.constant 13 : index
    %c32_366 = arith.constant 32 : index
    %335 = vector.load %arg7[%c13_365, %c32_366] : memref<27x64xf32, #tpu.memory_space<vmem>>, vector<1x16xf32>
    tpu.vector_store %arg7[%c13_365, %c32_366], %334 {strides = array<i32>} : memref<27x64xf32, #tpu.memory_space<vmem>>, vector<1x16xf32>,
    %c3_i32_367 = arith.constant 3 : i32
    %336 = arith.addi %5, %c3_i32_367 : i32
    %c1_i32_368 = arith.constant 1 : i32
    %337 = arith.addi %336, %c1_i32_368 : i32
    %c0_369 = arith.constant 0 : index
    %c1_370 = arith.constant 1 : index
    %338 = arith.index_cast %337 : i32 to index
    %c1_371 = arith.constant 1 : index
    %339 = vector.load %arg3[%c0_369, %c1_370, %338, %c1_371] : memref<1x3x18x18xf32, #tpu.memory_space<vmem>>, vector<1x1x1x16xf32>
    %340 = vector.shape_cast %339 : vector<1x1x1x16xf32> to vector<1x16xf32>
    %c13_372 = arith.constant 13 : index
    %c48_373 = arith.constant 48 : index
    %341 = vector.load %arg7[%c13_372, %c48_373] : memref<27x64xf32, #tpu.memory_space<vmem>>, vector<1x16xf32>
    tpu.vector_store %arg7[%c13_372, %c48_373], %340 {strides = array<i32>} : memref<27x64xf32, #tpu.memory_space<vmem>>, vector<1x16xf32>,
    %c0_i32_374 = arith.constant 0 : i32
    %342 = arith.addi %5, %c0_i32_374 : i32
    %c1_i32_375 = arith.constant 1 : i32
    %343 = arith.addi %342, %c1_i32_375 : i32
    %c0_376 = arith.constant 0 : index
    %c2_377 = arith.constant 2 : index
    %344 = arith.index_cast %343 : i32 to index
    %c1_378 = arith.constant 1 : index
    %345 = vector.load %arg3[%c0_376, %c2_377, %344, %c1_378] : memref<1x3x18x18xf32, #tpu.memory_space<vmem>>, vector<1x1x1x16xf32>
    %346 = vector.shape_cast %345 : vector<1x1x1x16xf32> to vector<1x16xf32>
    %c14 = arith.constant 14 : index
    %c0_379 = arith.constant 0 : index
    %347 = vector.load %arg7[%c14, %c0_379] : memref<27x64xf32, #tpu.memory_space<vmem>>, vector<1x16xf32>
    tpu.vector_store %arg7[%c14, %c0_379], %346 {strides = array<i32>} : memref<27x64xf32, #tpu.memory_space<vmem>>, vector<1x16xf32>,
    %c1_i32_380 = arith.constant 1 : i32
    %348 = arith.addi %5, %c1_i32_380 : i32
    %c1_i32_381 = arith.constant 1 : i32
    %349 = arith.addi %348, %c1_i32_381 : i32
    %c0_382 = arith.constant 0 : index
    %c2_383 = arith.constant 2 : index
    %350 = arith.index_cast %349 : i32 to index
    %c1_384 = arith.constant 1 : index
    %351 = vector.load %arg3[%c0_382, %c2_383, %350, %c1_384] : memref<1x3x18x18xf32, #tpu.memory_space<vmem>>, vector<1x1x1x16xf32>
    %352 = vector.shape_cast %351 : vector<1x1x1x16xf32> to vector<1x16xf32>
    %c14_385 = arith.constant 14 : index
    %c16_386 = arith.constant 16 : index
    %353 = vector.load %arg7[%c14_385, %c16_386] : memref<27x64xf32, #tpu.memory_space<vmem>>, vector<1x16xf32>
    tpu.vector_store %arg7[%c14_385, %c16_386], %352 {strides = array<i32>} : memref<27x64xf32, #tpu.memory_space<vmem>>, vector<1x16xf32>,
    %c2_i32_387 = arith.constant 2 : i32
    %354 = arith.addi %5, %c2_i32_387 : i32
    %c1_i32_388 = arith.constant 1 : i32
    %355 = arith.addi %354, %c1_i32_388 : i32
    %c0_389 = arith.constant 0 : index
    %c2_390 = arith.constant 2 : index
    %356 = arith.index_cast %355 : i32 to index
    %c1_391 = arith.constant 1 : index
    %357 = vector.load %arg3[%c0_389, %c2_390, %356, %c1_391] : memref<1x3x18x18xf32, #tpu.memory_space<vmem>>, vector<1x1x1x16xf32>
    %358 = vector.shape_cast %357 : vector<1x1x1x16xf32> to vector<1x16xf32>
    %c14_392 = arith.constant 14 : index
    %c32_393 = arith.constant 32 : index
    %359 = vector.load %arg7[%c14_392, %c32_393] : memref<27x64xf32, #tpu.memory_space<vmem>>, vector<1x16xf32>
    tpu.vector_store %arg7[%c14_392, %c32_393], %358 {strides = array<i32>} : memref<27x64xf32, #tpu.memory_space<vmem>>, vector<1x16xf32>,
    %c3_i32_394 = arith.constant 3 : i32
    %360 = arith.addi %5, %c3_i32_394 : i32
    %c1_i32_395 = arith.constant 1 : i32
    %361 = arith.addi %360, %c1_i32_395 : i32
    %c0_396 = arith.constant 0 : index
    %c2_397 = arith.constant 2 : index
    %362 = arith.index_cast %361 : i32 to index
    %c1_398 = arith.constant 1 : index
    %363 = vector.load %arg3[%c0_396, %c2_397, %362, %c1_398] : memref<1x3x18x18xf32, #tpu.memory_space<vmem>>, vector<1x1x1x16xf32>
    %364 = vector.shape_cast %363 : vector<1x1x1x16xf32> to vector<1x16xf32>
    %c14_399 = arith.constant 14 : index
    %c48_400 = arith.constant 48 : index
    %365 = vector.load %arg7[%c14_399, %c48_400] : memref<27x64xf32, #tpu.memory_space<vmem>>, vector<1x16xf32>
    tpu.vector_store %arg7[%c14_399, %c48_400], %364 {strides = array<i32>} : memref<27x64xf32, #tpu.memory_space<vmem>>, vector<1x16xf32>,
    %c0_i32_401 = arith.constant 0 : i32
    %366 = arith.addi %5, %c0_i32_401 : i32
    %c1_i32_402 = arith.constant 1 : i32
    %367 = arith.addi %366, %c1_i32_402 : i32
    %c0_403 = arith.constant 0 : index
    %c0_404 = arith.constant 0 : index
    %368 = arith.index_cast %367 : i32 to index
    %c2_405 = arith.constant 2 : index
    %369 = vector.load %arg3[%c0_403, %c0_404, %368, %c2_405] : memref<1x3x18x18xf32, #tpu.memory_space<vmem>>, vector<1x1x1x16xf32>
    %370 = vector.shape_cast %369 : vector<1x1x1x16xf32> to vector<1x16xf32>
    %c15 = arith.constant 15 : index
    %c0_406 = arith.constant 0 : index
    %371 = vector.load %arg7[%c15, %c0_406] : memref<27x64xf32, #tpu.memory_space<vmem>>, vector<1x16xf32>
    tpu.vector_store %arg7[%c15, %c0_406], %370 {strides = array<i32>} : memref<27x64xf32, #tpu.memory_space<vmem>>, vector<1x16xf32>,
    %c1_i32_407 = arith.constant 1 : i32
    %372 = arith.addi %5, %c1_i32_407 : i32
    %c1_i32_408 = arith.constant 1 : i32
    %373 = arith.addi %372, %c1_i32_408 : i32
    %c0_409 = arith.constant 0 : index
    %c0_410 = arith.constant 0 : index
    %374 = arith.index_cast %373 : i32 to index
    %c2_411 = arith.constant 2 : index
    %375 = vector.load %arg3[%c0_409, %c0_410, %374, %c2_411] : memref<1x3x18x18xf32, #tpu.memory_space<vmem>>, vector<1x1x1x16xf32>
    %376 = vector.shape_cast %375 : vector<1x1x1x16xf32> to vector<1x16xf32>
    %c15_412 = arith.constant 15 : index
    %c16_413 = arith.constant 16 : index
    %377 = vector.load %arg7[%c15_412, %c16_413] : memref<27x64xf32, #tpu.memory_space<vmem>>, vector<1x16xf32>
    tpu.vector_store %arg7[%c15_412, %c16_413], %376 {strides = array<i32>} : memref<27x64xf32, #tpu.memory_space<vmem>>, vector<1x16xf32>,
    %c2_i32_414 = arith.constant 2 : i32
    %378 = arith.addi %5, %c2_i32_414 : i32
    %c1_i32_415 = arith.constant 1 : i32
    %379 = arith.addi %378, %c1_i32_415 : i32
    %c0_416 = arith.constant 0 : index
    %c0_417 = arith.constant 0 : index
    %380 = arith.index_cast %379 : i32 to index
    %c2_418 = arith.constant 2 : index
    %381 = vector.load %arg3[%c0_416, %c0_417, %380, %c2_418] : memref<1x3x18x18xf32, #tpu.memory_space<vmem>>, vector<1x1x1x16xf32>
    %382 = vector.shape_cast %381 : vector<1x1x1x16xf32> to vector<1x16xf32>
    %c15_419 = arith.constant 15 : index
    %c32_420 = arith.constant 32 : index
    %383 = vector.load %arg7[%c15_419, %c32_420] : memref<27x64xf32, #tpu.memory_space<vmem>>, vector<1x16xf32>
    tpu.vector_store %arg7[%c15_419, %c32_420], %382 {strides = array<i32>} : memref<27x64xf32, #tpu.memory_space<vmem>>, vector<1x16xf32>,
    %c3_i32_421 = arith.constant 3 : i32
    %384 = arith.addi %5, %c3_i32_421 : i32
    %c1_i32_422 = arith.constant 1 : i32
    %385 = arith.addi %384, %c1_i32_422 : i32
    %c0_423 = arith.constant 0 : index
    %c0_424 = arith.constant 0 : index
    %386 = arith.index_cast %385 : i32 to index
    %c2_425 = arith.constant 2 : index
    %387 = vector.load %arg3[%c0_423, %c0_424, %386, %c2_425] : memref<1x3x18x18xf32, #tpu.memory_space<vmem>>, vector<1x1x1x16xf32>
    %388 = vector.shape_cast %387 : vector<1x1x1x16xf32> to vector<1x16xf32>
    %c15_426 = arith.constant 15 : index
    %c48_427 = arith.constant 48 : index
    %389 = vector.load %arg7[%c15_426, %c48_427] : memref<27x64xf32, #tpu.memory_space<vmem>>, vector<1x16xf32>
    tpu.vector_store %arg7[%c15_426, %c48_427], %388 {strides = array<i32>} : memref<27x64xf32, #tpu.memory_space<vmem>>, vector<1x16xf32>,
    %c0_i32_428 = arith.constant 0 : i32
    %390 = arith.addi %5, %c0_i32_428 : i32
    %c1_i32_429 = arith.constant 1 : i32
    %391 = arith.addi %390, %c1_i32_429 : i32
    %c0_430 = arith.constant 0 : index
    %c1_431 = arith.constant 1 : index
    %392 = arith.index_cast %391 : i32 to index
    %c2_432 = arith.constant 2 : index
    %393 = vector.load %arg3[%c0_430, %c1_431, %392, %c2_432] : memref<1x3x18x18xf32, #tpu.memory_space<vmem>>, vector<1x1x1x16xf32>
    %394 = vector.shape_cast %393 : vector<1x1x1x16xf32> to vector<1x16xf32>
    %c16_433 = arith.constant 16 : index
    %c0_434 = arith.constant 0 : index
    %395 = vector.load %arg7[%c16_433, %c0_434] : memref<27x64xf32, #tpu.memory_space<vmem>>, vector<1x16xf32>
    tpu.vector_store %arg7[%c16_433, %c0_434], %394 {strides = array<i32>} : memref<27x64xf32, #tpu.memory_space<vmem>>, vector<1x16xf32>,
    %c1_i32_435 = arith.constant 1 : i32
    %396 = arith.addi %5, %c1_i32_435 : i32
    %c1_i32_436 = arith.constant 1 : i32
    %397 = arith.addi %396, %c1_i32_436 : i32
    %c0_437 = arith.constant 0 : index
    %c1_438 = arith.constant 1 : index
    %398 = arith.index_cast %397 : i32 to index
    %c2_439 = arith.constant 2 : index
    %399 = vector.load %arg3[%c0_437, %c1_438, %398, %c2_439] : memref<1x3x18x18xf32, #tpu.memory_space<vmem>>, vector<1x1x1x16xf32>
    %400 = vector.shape_cast %399 : vector<1x1x1x16xf32> to vector<1x16xf32>
    %c16_440 = arith.constant 16 : index
    %c16_441 = arith.constant 16 : index
    %401 = vector.load %arg7[%c16_440, %c16_441] : memref<27x64xf32, #tpu.memory_space<vmem>>, vector<1x16xf32>
    tpu.vector_store %arg7[%c16_440, %c16_441], %400 {strides = array<i32>} : memref<27x64xf32, #tpu.memory_space<vmem>>, vector<1x16xf32>,
    %c2_i32_442 = arith.constant 2 : i32
    %402 = arith.addi %5, %c2_i32_442 : i32
    %c1_i32_443 = arith.constant 1 : i32
    %403 = arith.addi %402, %c1_i32_443 : i32
    %c0_444 = arith.constant 0 : index
    %c1_445 = arith.constant 1 : index
    %404 = arith.index_cast %403 : i32 to index
    %c2_446 = arith.constant 2 : index
    %405 = vector.load %arg3[%c0_444, %c1_445, %404, %c2_446] : memref<1x3x18x18xf32, #tpu.memory_space<vmem>>, vector<1x1x1x16xf32>
    %406 = vector.shape_cast %405 : vector<1x1x1x16xf32> to vector<1x16xf32>
    %c16_447 = arith.constant 16 : index
    %c32_448 = arith.constant 32 : index
    %407 = vector.load %arg7[%c16_447, %c32_448] : memref<27x64xf32, #tpu.memory_space<vmem>>, vector<1x16xf32>
    tpu.vector_store %arg7[%c16_447, %c32_448], %406 {strides = array<i32>} : memref<27x64xf32, #tpu.memory_space<vmem>>, vector<1x16xf32>,
    %c3_i32_449 = arith.constant 3 : i32
    %408 = arith.addi %5, %c3_i32_449 : i32
    %c1_i32_450 = arith.constant 1 : i32
    %409 = arith.addi %408, %c1_i32_450 : i32
    %c0_451 = arith.constant 0 : index
    %c1_452 = arith.constant 1 : index
    %410 = arith.index_cast %409 : i32 to index
    %c2_453 = arith.constant 2 : index
    %411 = vector.load %arg3[%c0_451, %c1_452, %410, %c2_453] : memref<1x3x18x18xf32, #tpu.memory_space<vmem>>, vector<1x1x1x16xf32>
    %412 = vector.shape_cast %411 : vector<1x1x1x16xf32> to vector<1x16xf32>
    %c16_454 = arith.constant 16 : index
    %c48_455 = arith.constant 48 : index
    %413 = vector.load %arg7[%c16_454, %c48_455] : memref<27x64xf32, #tpu.memory_space<vmem>>, vector<1x16xf32>
    tpu.vector_store %arg7[%c16_454, %c48_455], %412 {strides = array<i32>} : memref<27x64xf32, #tpu.memory_space<vmem>>, vector<1x16xf32>,
    %c0_i32_456 = arith.constant 0 : i32
    %414 = arith.addi %5, %c0_i32_456 : i32
    %c1_i32_457 = arith.constant 1 : i32
    %415 = arith.addi %414, %c1_i32_457 : i32
    %c0_458 = arith.constant 0 : index
    %c2_459 = arith.constant 2 : index
    %416 = arith.index_cast %415 : i32 to index
    %c2_460 = arith.constant 2 : index
    %417 = vector.load %arg3[%c0_458, %c2_459, %416, %c2_460] : memref<1x3x18x18xf32, #tpu.memory_space<vmem>>, vector<1x1x1x16xf32>
    %418 = vector.shape_cast %417 : vector<1x1x1x16xf32> to vector<1x16xf32>
    %c17 = arith.constant 17 : index
    %c0_461 = arith.constant 0 : index
    %419 = vector.load %arg7[%c17, %c0_461] : memref<27x64xf32, #tpu.memory_space<vmem>>, vector<1x16xf32>
    tpu.vector_store %arg7[%c17, %c0_461], %418 {strides = array<i32>} : memref<27x64xf32, #tpu.memory_space<vmem>>, vector<1x16xf32>,
    %c1_i32_462 = arith.constant 1 : i32
    %420 = arith.addi %5, %c1_i32_462 : i32
    %c1_i32_463 = arith.constant 1 : i32
    %421 = arith.addi %420, %c1_i32_463 : i32
    %c0_464 = arith.constant 0 : index
    %c2_465 = arith.constant 2 : index
    %422 = arith.index_cast %421 : i32 to index
    %c2_466 = arith.constant 2 : index
    %423 = vector.load %arg3[%c0_464, %c2_465, %422, %c2_466] : memref<1x3x18x18xf32, #tpu.memory_space<vmem>>, vector<1x1x1x16xf32>
    %424 = vector.shape_cast %423 : vector<1x1x1x16xf32> to vector<1x16xf32>
    %c17_467 = arith.constant 17 : index
    %c16_468 = arith.constant 16 : index
    %425 = vector.load %arg7[%c17_467, %c16_468] : memref<27x64xf32, #tpu.memory_space<vmem>>, vector<1x16xf32>
    tpu.vector_store %arg7[%c17_467, %c16_468], %424 {strides = array<i32>} : memref<27x64xf32, #tpu.memory_space<vmem>>, vector<1x16xf32>,
    %c2_i32_469 = arith.constant 2 : i32
    %426 = arith.addi %5, %c2_i32_469 : i32
    %c1_i32_470 = arith.constant 1 : i32
    %427 = arith.addi %426, %c1_i32_470 : i32
    %c0_471 = arith.constant 0 : index
    %c2_472 = arith.constant 2 : index
    %428 = arith.index_cast %427 : i32 to index
    %c2_473 = arith.constant 2 : index
    %429 = vector.load %arg3[%c0_471, %c2_472, %428, %c2_473] : memref<1x3x18x18xf32, #tpu.memory_space<vmem>>, vector<1x1x1x16xf32>
    %430 = vector.shape_cast %429 : vector<1x1x1x16xf32> to vector<1x16xf32>
    %c17_474 = arith.constant 17 : index
    %c32_475 = arith.constant 32 : index
    %431 = vector.load %arg7[%c17_474, %c32_475] : memref<27x64xf32, #tpu.memory_space<vmem>>, vector<1x16xf32>
    tpu.vector_store %arg7[%c17_474, %c32_475], %430 {strides = array<i32>} : memref<27x64xf32, #tpu.memory_space<vmem>>, vector<1x16xf32>,
    %c3_i32_476 = arith.constant 3 : i32
    %432 = arith.addi %5, %c3_i32_476 : i32
    %c1_i32_477 = arith.constant 1 : i32
    %433 = arith.addi %432, %c1_i32_477 : i32
    %c0_478 = arith.constant 0 : index
    %c2_479 = arith.constant 2 : index
    %434 = arith.index_cast %433 : i32 to index
    %c2_480 = arith.constant 2 : index
    %435 = vector.load %arg3[%c0_478, %c2_479, %434, %c2_480] : memref<1x3x18x18xf32, #tpu.memory_space<vmem>>, vector<1x1x1x16xf32>
    %436 = vector.shape_cast %435 : vector<1x1x1x16xf32> to vector<1x16xf32>
    %c17_481 = arith.constant 17 : index
    %c48_482 = arith.constant 48 : index
    %437 = vector.load %arg7[%c17_481, %c48_482] : memref<27x64xf32, #tpu.memory_space<vmem>>, vector<1x16xf32>
    tpu.vector_store %arg7[%c17_481, %c48_482], %436 {strides = array<i32>} : memref<27x64xf32, #tpu.memory_space<vmem>>, vector<1x16xf32>,
    %c0_i32_483 = arith.constant 0 : i32
    %438 = arith.addi %5, %c0_i32_483 : i32
    %c2_i32_484 = arith.constant 2 : i32
    %439 = arith.addi %438, %c2_i32_484 : i32
    %c0_485 = arith.constant 0 : index
    %c0_486 = arith.constant 0 : index
    %440 = arith.index_cast %439 : i32 to index
    %c0_487 = arith.constant 0 : index
    %441 = vector.load %arg3[%c0_485, %c0_486, %440, %c0_487] : memref<1x3x18x18xf32, #tpu.memory_space<vmem>>, vector<1x1x1x16xf32>
    %442 = vector.shape_cast %441 : vector<1x1x1x16xf32> to vector<1x16xf32>
    %c18 = arith.constant 18 : index
    %c0_488 = arith.constant 0 : index
    %443 = vector.load %arg7[%c18, %c0_488] : memref<27x64xf32, #tpu.memory_space<vmem>>, vector<1x16xf32>
    tpu.vector_store %arg7[%c18, %c0_488], %442 {strides = array<i32>} : memref<27x64xf32, #tpu.memory_space<vmem>>, vector<1x16xf32>,
    %c1_i32_489 = arith.constant 1 : i32
    %444 = arith.addi %5, %c1_i32_489 : i32
    %c2_i32_490 = arith.constant 2 : i32
    %445 = arith.addi %444, %c2_i32_490 : i32
    %c0_491 = arith.constant 0 : index
    %c0_492 = arith.constant 0 : index
    %446 = arith.index_cast %445 : i32 to index
    %c0_493 = arith.constant 0 : index
    %447 = vector.load %arg3[%c0_491, %c0_492, %446, %c0_493] : memref<1x3x18x18xf32, #tpu.memory_space<vmem>>, vector<1x1x1x16xf32>
    %448 = vector.shape_cast %447 : vector<1x1x1x16xf32> to vector<1x16xf32>
    %c18_494 = arith.constant 18 : index
    %c16_495 = arith.constant 16 : index
    %449 = vector.load %arg7[%c18_494, %c16_495] : memref<27x64xf32, #tpu.memory_space<vmem>>, vector<1x16xf32>
    tpu.vector_store %arg7[%c18_494, %c16_495], %448 {strides = array<i32>} : memref<27x64xf32, #tpu.memory_space<vmem>>, vector<1x16xf32>,
    %c2_i32_496 = arith.constant 2 : i32
    %450 = arith.addi %5, %c2_i32_496 : i32
    %c2_i32_497 = arith.constant 2 : i32
    %451 = arith.addi %450, %c2_i32_497 : i32
    %c0_498 = arith.constant 0 : index
    %c0_499 = arith.constant 0 : index
    %452 = arith.index_cast %451 : i32 to index
    %c0_500 = arith.constant 0 : index
    %453 = vector.load %arg3[%c0_498, %c0_499, %452, %c0_500] : memref<1x3x18x18xf32, #tpu.memory_space<vmem>>, vector<1x1x1x16xf32>
    %454 = vector.shape_cast %453 : vector<1x1x1x16xf32> to vector<1x16xf32>
    %c18_501 = arith.constant 18 : index
    %c32_502 = arith.constant 32 : index
    %455 = vector.load %arg7[%c18_501, %c32_502] : memref<27x64xf32, #tpu.memory_space<vmem>>, vector<1x16xf32>
    tpu.vector_store %arg7[%c18_501, %c32_502], %454 {strides = array<i32>} : memref<27x64xf32, #tpu.memory_space<vmem>>, vector<1x16xf32>,
    %c3_i32_503 = arith.constant 3 : i32
    %456 = arith.addi %5, %c3_i32_503 : i32
    %c2_i32_504 = arith.constant 2 : i32
    %457 = arith.addi %456, %c2_i32_504 : i32
    %c0_505 = arith.constant 0 : index
    %c0_506 = arith.constant 0 : index
    %458 = arith.index_cast %457 : i32 to index
    %c0_507 = arith.constant 0 : index
    %459 = vector.load %arg3[%c0_505, %c0_506, %458, %c0_507] : memref<1x3x18x18xf32, #tpu.memory_space<vmem>>, vector<1x1x1x16xf32>
    %460 = vector.shape_cast %459 : vector<1x1x1x16xf32> to vector<1x16xf32>
    %c18_508 = arith.constant 18 : index
    %c48_509 = arith.constant 48 : index
    %461 = vector.load %arg7[%c18_508, %c48_509] : memref<27x64xf32, #tpu.memory_space<vmem>>, vector<1x16xf32>
    tpu.vector_store %arg7[%c18_508, %c48_509], %460 {strides = array<i32>} : memref<27x64xf32, #tpu.memory_space<vmem>>, vector<1x16xf32>,
    %c0_i32_510 = arith.constant 0 : i32
    %462 = arith.addi %5, %c0_i32_510 : i32
    %c2_i32_511 = arith.constant 2 : i32
    %463 = arith.addi %462, %c2_i32_511 : i32
    %c0_512 = arith.constant 0 : index
    %c1_513 = arith.constant 1 : index
    %464 = arith.index_cast %463 : i32 to index
    %c0_514 = arith.constant 0 : index
    %465 = vector.load %arg3[%c0_512, %c1_513, %464, %c0_514] : memref<1x3x18x18xf32, #tpu.memory_space<vmem>>, vector<1x1x1x16xf32>
    %466 = vector.shape_cast %465 : vector<1x1x1x16xf32> to vector<1x16xf32>
    %c19 = arith.constant 19 : index
    %c0_515 = arith.constant 0 : index
    %467 = vector.load %arg7[%c19, %c0_515] : memref<27x64xf32, #tpu.memory_space<vmem>>, vector<1x16xf32>
    tpu.vector_store %arg7[%c19, %c0_515], %466 {strides = array<i32>} : memref<27x64xf32, #tpu.memory_space<vmem>>, vector<1x16xf32>,
    %c1_i32_516 = arith.constant 1 : i32
    %468 = arith.addi %5, %c1_i32_516 : i32
    %c2_i32_517 = arith.constant 2 : i32
    %469 = arith.addi %468, %c2_i32_517 : i32
    %c0_518 = arith.constant 0 : index
    %c1_519 = arith.constant 1 : index
    %470 = arith.index_cast %469 : i32 to index
    %c0_520 = arith.constant 0 : index
    %471 = vector.load %arg3[%c0_518, %c1_519, %470, %c0_520] : memref<1x3x18x18xf32, #tpu.memory_space<vmem>>, vector<1x1x1x16xf32>
    %472 = vector.shape_cast %471 : vector<1x1x1x16xf32> to vector<1x16xf32>
    %c19_521 = arith.constant 19 : index
    %c16_522 = arith.constant 16 : index
    %473 = vector.load %arg7[%c19_521, %c16_522] : memref<27x64xf32, #tpu.memory_space<vmem>>, vector<1x16xf32>
    tpu.vector_store %arg7[%c19_521, %c16_522], %472 {strides = array<i32>} : memref<27x64xf32, #tpu.memory_space<vmem>>, vector<1x16xf32>,
    %c2_i32_523 = arith.constant 2 : i32
    %474 = arith.addi %5, %c2_i32_523 : i32
    %c2_i32_524 = arith.constant 2 : i32
    %475 = arith.addi %474, %c2_i32_524 : i32
    %c0_525 = arith.constant 0 : index
    %c1_526 = arith.constant 1 : index
    %476 = arith.index_cast %475 : i32 to index
    %c0_527 = arith.constant 0 : index
    %477 = vector.load %arg3[%c0_525, %c1_526, %476, %c0_527] : memref<1x3x18x18xf32, #tpu.memory_space<vmem>>, vector<1x1x1x16xf32>
    %478 = vector.shape_cast %477 : vector<1x1x1x16xf32> to vector<1x16xf32>
    %c19_528 = arith.constant 19 : index
    %c32_529 = arith.constant 32 : index
    %479 = vector.load %arg7[%c19_528, %c32_529] : memref<27x64xf32, #tpu.memory_space<vmem>>, vector<1x16xf32>
    tpu.vector_store %arg7[%c19_528, %c32_529], %478 {strides = array<i32>} : memref<27x64xf32, #tpu.memory_space<vmem>>, vector<1x16xf32>,
    %c3_i32_530 = arith.constant 3 : i32
    %480 = arith.addi %5, %c3_i32_530 : i32
    %c2_i32_531 = arith.constant 2 : i32
    %481 = arith.addi %480, %c2_i32_531 : i32
    %c0_532 = arith.constant 0 : index
    %c1_533 = arith.constant 1 : index
    %482 = arith.index_cast %481 : i32 to index
    %c0_534 = arith.constant 0 : index
    %483 = vector.load %arg3[%c0_532, %c1_533, %482, %c0_534] : memref<1x3x18x18xf32, #tpu.memory_space<vmem>>, vector<1x1x1x16xf32>
    %484 = vector.shape_cast %483 : vector<1x1x1x16xf32> to vector<1x16xf32>
    %c19_535 = arith.constant 19 : index
    %c48_536 = arith.constant 48 : index
    %485 = vector.load %arg7[%c19_535, %c48_536] : memref<27x64xf32, #tpu.memory_space<vmem>>, vector<1x16xf32>
    tpu.vector_store %arg7[%c19_535, %c48_536], %484 {strides = array<i32>} : memref<27x64xf32, #tpu.memory_space<vmem>>, vector<1x16xf32>,
    %c0_i32_537 = arith.constant 0 : i32
    %486 = arith.addi %5, %c0_i32_537 : i32
    %c2_i32_538 = arith.constant 2 : i32
    %487 = arith.addi %486, %c2_i32_538 : i32
    %c0_539 = arith.constant 0 : index
    %c2_540 = arith.constant 2 : index
    %488 = arith.index_cast %487 : i32 to index
    %c0_541 = arith.constant 0 : index
    %489 = vector.load %arg3[%c0_539, %c2_540, %488, %c0_541] : memref<1x3x18x18xf32, #tpu.memory_space<vmem>>, vector<1x1x1x16xf32>
    %490 = vector.shape_cast %489 : vector<1x1x1x16xf32> to vector<1x16xf32>
    %c20 = arith.constant 20 : index
    %c0_542 = arith.constant 0 : index
    %491 = vector.load %arg7[%c20, %c0_542] : memref<27x64xf32, #tpu.memory_space<vmem>>, vector<1x16xf32>
    tpu.vector_store %arg7[%c20, %c0_542], %490 {strides = array<i32>} : memref<27x64xf32, #tpu.memory_space<vmem>>, vector<1x16xf32>,
    %c1_i32_543 = arith.constant 1 : i32
    %492 = arith.addi %5, %c1_i32_543 : i32
    %c2_i32_544 = arith.constant 2 : i32
    %493 = arith.addi %492, %c2_i32_544 : i32
    %c0_545 = arith.constant 0 : index
    %c2_546 = arith.constant 2 : index
    %494 = arith.index_cast %493 : i32 to index
    %c0_547 = arith.constant 0 : index
    %495 = vector.load %arg3[%c0_545, %c2_546, %494, %c0_547] : memref<1x3x18x18xf32, #tpu.memory_space<vmem>>, vector<1x1x1x16xf32>
    %496 = vector.shape_cast %495 : vector<1x1x1x16xf32> to vector<1x16xf32>
    %c20_548 = arith.constant 20 : index
    %c16_549 = arith.constant 16 : index
    %497 = vector.load %arg7[%c20_548, %c16_549] : memref<27x64xf32, #tpu.memory_space<vmem>>, vector<1x16xf32>
    tpu.vector_store %arg7[%c20_548, %c16_549], %496 {strides = array<i32>} : memref<27x64xf32, #tpu.memory_space<vmem>>, vector<1x16xf32>,
    %c2_i32_550 = arith.constant 2 : i32
    %498 = arith.addi %5, %c2_i32_550 : i32
    %c2_i32_551 = arith.constant 2 : i32
    %499 = arith.addi %498, %c2_i32_551 : i32
    %c0_552 = arith.constant 0 : index
    %c2_553 = arith.constant 2 : index
    %500 = arith.index_cast %499 : i32 to index
    %c0_554 = arith.constant 0 : index
    %501 = vector.load %arg3[%c0_552, %c2_553, %500, %c0_554] : memref<1x3x18x18xf32, #tpu.memory_space<vmem>>, vector<1x1x1x16xf32>
    %502 = vector.shape_cast %501 : vector<1x1x1x16xf32> to vector<1x16xf32>
    %c20_555 = arith.constant 20 : index
    %c32_556 = arith.constant 32 : index
    %503 = vector.load %arg7[%c20_555, %c32_556] : memref<27x64xf32, #tpu.memory_space<vmem>>, vector<1x16xf32>
    tpu.vector_store %arg7[%c20_555, %c32_556], %502 {strides = array<i32>} : memref<27x64xf32, #tpu.memory_space<vmem>>, vector<1x16xf32>,
    %c3_i32_557 = arith.constant 3 : i32
    %504 = arith.addi %5, %c3_i32_557 : i32
    %c2_i32_558 = arith.constant 2 : i32
    %505 = arith.addi %504, %c2_i32_558 : i32
    %c0_559 = arith.constant 0 : index
    %c2_560 = arith.constant 2 : index
    %506 = arith.index_cast %505 : i32 to index
    %c0_561 = arith.constant 0 : index
    %507 = vector.load %arg3[%c0_559, %c2_560, %506, %c0_561] : memref<1x3x18x18xf32, #tpu.memory_space<vmem>>, vector<1x1x1x16xf32>
    %508 = vector.shape_cast %507 : vector<1x1x1x16xf32> to vector<1x16xf32>
    %c20_562 = arith.constant 20 : index
    %c48_563 = arith.constant 48 : index
    %509 = vector.load %arg7[%c20_562, %c48_563] : memref<27x64xf32, #tpu.memory_space<vmem>>, vector<1x16xf32>
    tpu.vector_store %arg7[%c20_562, %c48_563], %508 {strides = array<i32>} : memref<27x64xf32, #tpu.memory_space<vmem>>, vector<1x16xf32>,
    %c0_i32_564 = arith.constant 0 : i32
    %510 = arith.addi %5, %c0_i32_564 : i32
    %c2_i32_565 = arith.constant 2 : i32
    %511 = arith.addi %510, %c2_i32_565 : i32
    %c0_566 = arith.constant 0 : index
    %c0_567 = arith.constant 0 : index
    %512 = arith.index_cast %511 : i32 to index
    %c1_568 = arith.constant 1 : index
    %513 = vector.load %arg3[%c0_566, %c0_567, %512, %c1_568] : memref<1x3x18x18xf32, #tpu.memory_space<vmem>>, vector<1x1x1x16xf32>
    %514 = vector.shape_cast %513 : vector<1x1x1x16xf32> to vector<1x16xf32>
    %c21 = arith.constant 21 : index
    %c0_569 = arith.constant 0 : index
    %515 = vector.load %arg7[%c21, %c0_569] : memref<27x64xf32, #tpu.memory_space<vmem>>, vector<1x16xf32>
    tpu.vector_store %arg7[%c21, %c0_569], %514 {strides = array<i32>} : memref<27x64xf32, #tpu.memory_space<vmem>>, vector<1x16xf32>,
    %c1_i32_570 = arith.constant 1 : i32
    %516 = arith.addi %5, %c1_i32_570 : i32
    %c2_i32_571 = arith.constant 2 : i32
    %517 = arith.addi %516, %c2_i32_571 : i32
    %c0_572 = arith.constant 0 : index
    %c0_573 = arith.constant 0 : index
    %518 = arith.index_cast %517 : i32 to index
    %c1_574 = arith.constant 1 : index
    %519 = vector.load %arg3[%c0_572, %c0_573, %518, %c1_574] : memref<1x3x18x18xf32, #tpu.memory_space<vmem>>, vector<1x1x1x16xf32>
    %520 = vector.shape_cast %519 : vector<1x1x1x16xf32> to vector<1x16xf32>
    %c21_575 = arith.constant 21 : index
    %c16_576 = arith.constant 16 : index
    %521 = vector.load %arg7[%c21_575, %c16_576] : memref<27x64xf32, #tpu.memory_space<vmem>>, vector<1x16xf32>
    tpu.vector_store %arg7[%c21_575, %c16_576], %520 {strides = array<i32>} : memref<27x64xf32, #tpu.memory_space<vmem>>, vector<1x16xf32>,
    %c2_i32_577 = arith.constant 2 : i32
    %522 = arith.addi %5, %c2_i32_577 : i32
    %c2_i32_578 = arith.constant 2 : i32
    %523 = arith.addi %522, %c2_i32_578 : i32
    %c0_579 = arith.constant 0 : index
    %c0_580 = arith.constant 0 : index
    %524 = arith.index_cast %523 : i32 to index
    %c1_581 = arith.constant 1 : index
    %525 = vector.load %arg3[%c0_579, %c0_580, %524, %c1_581] : memref<1x3x18x18xf32, #tpu.memory_space<vmem>>, vector<1x1x1x16xf32>
    %526 = vector.shape_cast %525 : vector<1x1x1x16xf32> to vector<1x16xf32>
    %c21_582 = arith.constant 21 : index
    %c32_583 = arith.constant 32 : index
    %527 = vector.load %arg7[%c21_582, %c32_583] : memref<27x64xf32, #tpu.memory_space<vmem>>, vector<1x16xf32>
    tpu.vector_store %arg7[%c21_582, %c32_583], %526 {strides = array<i32>} : memref<27x64xf32, #tpu.memory_space<vmem>>, vector<1x16xf32>,
    %c3_i32_584 = arith.constant 3 : i32
    %528 = arith.addi %5, %c3_i32_584 : i32
    %c2_i32_585 = arith.constant 2 : i32
    %529 = arith.addi %528, %c2_i32_585 : i32
    %c0_586 = arith.constant 0 : index
    %c0_587 = arith.constant 0 : index
    %530 = arith.index_cast %529 : i32 to index
    %c1_588 = arith.constant 1 : index
    %531 = vector.load %arg3[%c0_586, %c0_587, %530, %c1_588] : memref<1x3x18x18xf32, #tpu.memory_space<vmem>>, vector<1x1x1x16xf32>
    %532 = vector.shape_cast %531 : vector<1x1x1x16xf32> to vector<1x16xf32>
    %c21_589 = arith.constant 21 : index
    %c48_590 = arith.constant 48 : index
    %533 = vector.load %arg7[%c21_589, %c48_590] : memref<27x64xf32, #tpu.memory_space<vmem>>, vector<1x16xf32>
    tpu.vector_store %arg7[%c21_589, %c48_590], %532 {strides = array<i32>} : memref<27x64xf32, #tpu.memory_space<vmem>>, vector<1x16xf32>,
    %c0_i32_591 = arith.constant 0 : i32
    %534 = arith.addi %5, %c0_i32_591 : i32
    %c2_i32_592 = arith.constant 2 : i32
    %535 = arith.addi %534, %c2_i32_592 : i32
    %c0_593 = arith.constant 0 : index
    %c1_594 = arith.constant 1 : index
    %536 = arith.index_cast %535 : i32 to index
    %c1_595 = arith.constant 1 : index
    %537 = vector.load %arg3[%c0_593, %c1_594, %536, %c1_595] : memref<1x3x18x18xf32, #tpu.memory_space<vmem>>, vector<1x1x1x16xf32>
    %538 = vector.shape_cast %537 : vector<1x1x1x16xf32> to vector<1x16xf32>
    %c22 = arith.constant 22 : index
    %c0_596 = arith.constant 0 : index
    %539 = vector.load %arg7[%c22, %c0_596] : memref<27x64xf32, #tpu.memory_space<vmem>>, vector<1x16xf32>
    tpu.vector_store %arg7[%c22, %c0_596], %538 {strides = array<i32>} : memref<27x64xf32, #tpu.memory_space<vmem>>, vector<1x16xf32>,
    %c1_i32_597 = arith.constant 1 : i32
    %540 = arith.addi %5, %c1_i32_597 : i32
    %c2_i32_598 = arith.constant 2 : i32
    %541 = arith.addi %540, %c2_i32_598 : i32
    %c0_599 = arith.constant 0 : index
    %c1_600 = arith.constant 1 : index
    %542 = arith.index_cast %541 : i32 to index
    %c1_601 = arith.constant 1 : index
    %543 = vector.load %arg3[%c0_599, %c1_600, %542, %c1_601] : memref<1x3x18x18xf32, #tpu.memory_space<vmem>>, vector<1x1x1x16xf32>
    %544 = vector.shape_cast %543 : vector<1x1x1x16xf32> to vector<1x16xf32>
    %c22_602 = arith.constant 22 : index
    %c16_603 = arith.constant 16 : index
    %545 = vector.load %arg7[%c22_602, %c16_603] : memref<27x64xf32, #tpu.memory_space<vmem>>, vector<1x16xf32>
    tpu.vector_store %arg7[%c22_602, %c16_603], %544 {strides = array<i32>} : memref<27x64xf32, #tpu.memory_space<vmem>>, vector<1x16xf32>,
    %c2_i32_604 = arith.constant 2 : i32
    %546 = arith.addi %5, %c2_i32_604 : i32
    %c2_i32_605 = arith.constant 2 : i32
    %547 = arith.addi %546, %c2_i32_605 : i32
    %c0_606 = arith.constant 0 : index
    %c1_607 = arith.constant 1 : index
    %548 = arith.index_cast %547 : i32 to index
    %c1_608 = arith.constant 1 : index
    %549 = vector.load %arg3[%c0_606, %c1_607, %548, %c1_608] : memref<1x3x18x18xf32, #tpu.memory_space<vmem>>, vector<1x1x1x16xf32>
    %550 = vector.shape_cast %549 : vector<1x1x1x16xf32> to vector<1x16xf32>
    %c22_609 = arith.constant 22 : index
    %c32_610 = arith.constant 32 : index
    %551 = vector.load %arg7[%c22_609, %c32_610] : memref<27x64xf32, #tpu.memory_space<vmem>>, vector<1x16xf32>
    tpu.vector_store %arg7[%c22_609, %c32_610], %550 {strides = array<i32>} : memref<27x64xf32, #tpu.memory_space<vmem>>, vector<1x16xf32>,
    %c3_i32_611 = arith.constant 3 : i32
    %552 = arith.addi %5, %c3_i32_611 : i32
    %c2_i32_612 = arith.constant 2 : i32
    %553 = arith.addi %552, %c2_i32_612 : i32
    %c0_613 = arith.constant 0 : index
    %c1_614 = arith.constant 1 : index
    %554 = arith.index_cast %553 : i32 to index
    %c1_615 = arith.constant 1 : index
    %555 = vector.load %arg3[%c0_613, %c1_614, %554, %c1_615] : memref<1x3x18x18xf32, #tpu.memory_space<vmem>>, vector<1x1x1x16xf32>
    %556 = vector.shape_cast %555 : vector<1x1x1x16xf32> to vector<1x16xf32>
    %c22_616 = arith.constant 22 : index
    %c48_617 = arith.constant 48 : index
    %557 = vector.load %arg7[%c22_616, %c48_617] : memref<27x64xf32, #tpu.memory_space<vmem>>, vector<1x16xf32>
    tpu.vector_store %arg7[%c22_616, %c48_617], %556 {strides = array<i32>} : memref<27x64xf32, #tpu.memory_space<vmem>>, vector<1x16xf32>,
    %c0_i32_618 = arith.constant 0 : i32
    %558 = arith.addi %5, %c0_i32_618 : i32
    %c2_i32_619 = arith.constant 2 : i32
    %559 = arith.addi %558, %c2_i32_619 : i32
    %c0_620 = arith.constant 0 : index
    %c2_621 = arith.constant 2 : index
    %560 = arith.index_cast %559 : i32 to index
    %c1_622 = arith.constant 1 : index
    %561 = vector.load %arg3[%c0_620, %c2_621, %560, %c1_622] : memref<1x3x18x18xf32, #tpu.memory_space<vmem>>, vector<1x1x1x16xf32>
    %562 = vector.shape_cast %561 : vector<1x1x1x16xf32> to vector<1x16xf32>
    %c23 = arith.constant 23 : index
    %c0_623 = arith.constant 0 : index
    %563 = vector.load %arg7[%c23, %c0_623] : memref<27x64xf32, #tpu.memory_space<vmem>>, vector<1x16xf32>
    tpu.vector_store %arg7[%c23, %c0_623], %562 {strides = array<i32>} : memref<27x64xf32, #tpu.memory_space<vmem>>, vector<1x16xf32>,
    %c1_i32_624 = arith.constant 1 : i32
    %564 = arith.addi %5, %c1_i32_624 : i32
    %c2_i32_625 = arith.constant 2 : i32
    %565 = arith.addi %564, %c2_i32_625 : i32
    %c0_626 = arith.constant 0 : index
    %c2_627 = arith.constant 2 : index
    %566 = arith.index_cast %565 : i32 to index
    %c1_628 = arith.constant 1 : index
    %567 = vector.load %arg3[%c0_626, %c2_627, %566, %c1_628] : memref<1x3x18x18xf32, #tpu.memory_space<vmem>>, vector<1x1x1x16xf32>
    %568 = vector.shape_cast %567 : vector<1x1x1x16xf32> to vector<1x16xf32>
    %c23_629 = arith.constant 23 : index
    %c16_630 = arith.constant 16 : index
    %569 = vector.load %arg7[%c23_629, %c16_630] : memref<27x64xf32, #tpu.memory_space<vmem>>, vector<1x16xf32>
    tpu.vector_store %arg7[%c23_629, %c16_630], %568 {strides = array<i32>} : memref<27x64xf32, #tpu.memory_space<vmem>>, vector<1x16xf32>,
    %c2_i32_631 = arith.constant 2 : i32
    %570 = arith.addi %5, %c2_i32_631 : i32
    %c2_i32_632 = arith.constant 2 : i32
    %571 = arith.addi %570, %c2_i32_632 : i32
    %c0_633 = arith.constant 0 : index
    %c2_634 = arith.constant 2 : index
    %572 = arith.index_cast %571 : i32 to index
    %c1_635 = arith.constant 1 : index
    %573 = vector.load %arg3[%c0_633, %c2_634, %572, %c1_635] : memref<1x3x18x18xf32, #tpu.memory_space<vmem>>, vector<1x1x1x16xf32>
    %574 = vector.shape_cast %573 : vector<1x1x1x16xf32> to vector<1x16xf32>
    %c23_636 = arith.constant 23 : index
    %c32_637 = arith.constant 32 : index
    %575 = vector.load %arg7[%c23_636, %c32_637] : memref<27x64xf32, #tpu.memory_space<vmem>>, vector<1x16xf32>
    tpu.vector_store %arg7[%c23_636, %c32_637], %574 {strides = array<i32>} : memref<27x64xf32, #tpu.memory_space<vmem>>, vector<1x16xf32>,
    %c3_i32_638 = arith.constant 3 : i32
    %576 = arith.addi %5, %c3_i32_638 : i32
    %c2_i32_639 = arith.constant 2 : i32
    %577 = arith.addi %576, %c2_i32_639 : i32
    %c0_640 = arith.constant 0 : index
    %c2_641 = arith.constant 2 : index
    %578 = arith.index_cast %577 : i32 to index
    %c1_642 = arith.constant 1 : index
    %579 = vector.load %arg3[%c0_640, %c2_641, %578, %c1_642] : memref<1x3x18x18xf32, #tpu.memory_space<vmem>>, vector<1x1x1x16xf32>
    %580 = vector.shape_cast %579 : vector<1x1x1x16xf32> to vector<1x16xf32>
    %c23_643 = arith.constant 23 : index
    %c48_644 = arith.constant 48 : index
    %581 = vector.load %arg7[%c23_643, %c48_644] : memref<27x64xf32, #tpu.memory_space<vmem>>, vector<1x16xf32>
    tpu.vector_store %arg7[%c23_643, %c48_644], %580 {strides = array<i32>} : memref<27x64xf32, #tpu.memory_space<vmem>>, vector<1x16xf32>,
    %c0_i32_645 = arith.constant 0 : i32
    %582 = arith.addi %5, %c0_i32_645 : i32
    %c2_i32_646 = arith.constant 2 : i32
    %583 = arith.addi %582, %c2_i32_646 : i32
    %c0_647 = arith.constant 0 : index
    %c0_648 = arith.constant 0 : index
    %584 = arith.index_cast %583 : i32 to index
    %c2_649 = arith.constant 2 : index
    %585 = vector.load %arg3[%c0_647, %c0_648, %584, %c2_649] : memref<1x3x18x18xf32, #tpu.memory_space<vmem>>, vector<1x1x1x16xf32>
    %586 = vector.shape_cast %585 : vector<1x1x1x16xf32> to vector<1x16xf32>
    %c24 = arith.constant 24 : index
    %c0_650 = arith.constant 0 : index
    %587 = vector.load %arg7[%c24, %c0_650] : memref<27x64xf32, #tpu.memory_space<vmem>>, vector<1x16xf32>
    tpu.vector_store %arg7[%c24, %c0_650], %586 {strides = array<i32>} : memref<27x64xf32, #tpu.memory_space<vmem>>, vector<1x16xf32>,
    %c1_i32_651 = arith.constant 1 : i32
    %588 = arith.addi %5, %c1_i32_651 : i32
    %c2_i32_652 = arith.constant 2 : i32
    %589 = arith.addi %588, %c2_i32_652 : i32
    %c0_653 = arith.constant 0 : index
    %c0_654 = arith.constant 0 : index
    %590 = arith.index_cast %589 : i32 to index
    %c2_655 = arith.constant 2 : index
    %591 = vector.load %arg3[%c0_653, %c0_654, %590, %c2_655] : memref<1x3x18x18xf32, #tpu.memory_space<vmem>>, vector<1x1x1x16xf32>
    %592 = vector.shape_cast %591 : vector<1x1x1x16xf32> to vector<1x16xf32>
    %c24_656 = arith.constant 24 : index
    %c16_657 = arith.constant 16 : index
    %593 = vector.load %arg7[%c24_656, %c16_657] : memref<27x64xf32, #tpu.memory_space<vmem>>, vector<1x16xf32>
    tpu.vector_store %arg7[%c24_656, %c16_657], %592 {strides = array<i32>} : memref<27x64xf32, #tpu.memory_space<vmem>>, vector<1x16xf32>,
    %c2_i32_658 = arith.constant 2 : i32
    %594 = arith.addi %5, %c2_i32_658 : i32
    %c2_i32_659 = arith.constant 2 : i32
    %595 = arith.addi %594, %c2_i32_659 : i32
    %c0_660 = arith.constant 0 : index
    %c0_661 = arith.constant 0 : index
    %596 = arith.index_cast %595 : i32 to index
    %c2_662 = arith.constant 2 : index
    %597 = vector.load %arg3[%c0_660, %c0_661, %596, %c2_662] : memref<1x3x18x18xf32, #tpu.memory_space<vmem>>, vector<1x1x1x16xf32>
    %598 = vector.shape_cast %597 : vector<1x1x1x16xf32> to vector<1x16xf32>
    %c24_663 = arith.constant 24 : index
    %c32_664 = arith.constant 32 : index
    %599 = vector.load %arg7[%c24_663, %c32_664] : memref<27x64xf32, #tpu.memory_space<vmem>>, vector<1x16xf32>
    tpu.vector_store %arg7[%c24_663, %c32_664], %598 {strides = array<i32>} : memref<27x64xf32, #tpu.memory_space<vmem>>, vector<1x16xf32>,
    %c3_i32_665 = arith.constant 3 : i32
    %600 = arith.addi %5, %c3_i32_665 : i32
    %c2_i32_666 = arith.constant 2 : i32
    %601 = arith.addi %600, %c2_i32_666 : i32
    %c0_667 = arith.constant 0 : index
    %c0_668 = arith.constant 0 : index
    %602 = arith.index_cast %601 : i32 to index
    %c2_669 = arith.constant 2 : index
    %603 = vector.load %arg3[%c0_667, %c0_668, %602, %c2_669] : memref<1x3x18x18xf32, #tpu.memory_space<vmem>>, vector<1x1x1x16xf32>
    %604 = vector.shape_cast %603 : vector<1x1x1x16xf32> to vector<1x16xf32>
    %c24_670 = arith.constant 24 : index
    %c48_671 = arith.constant 48 : index
    %605 = vector.load %arg7[%c24_670, %c48_671] : memref<27x64xf32, #tpu.memory_space<vmem>>, vector<1x16xf32>
    tpu.vector_store %arg7[%c24_670, %c48_671], %604 {strides = array<i32>} : memref<27x64xf32, #tpu.memory_space<vmem>>, vector<1x16xf32>,
    %c0_i32_672 = arith.constant 0 : i32
    %606 = arith.addi %5, %c0_i32_672 : i32
    %c2_i32_673 = arith.constant 2 : i32
    %607 = arith.addi %606, %c2_i32_673 : i32
    %c0_674 = arith.constant 0 : index
    %c1_675 = arith.constant 1 : index
    %608 = arith.index_cast %607 : i32 to index
    %c2_676 = arith.constant 2 : index
    %609 = vector.load %arg3[%c0_674, %c1_675, %608, %c2_676] : memref<1x3x18x18xf32, #tpu.memory_space<vmem>>, vector<1x1x1x16xf32>
    %610 = vector.shape_cast %609 : vector<1x1x1x16xf32> to vector<1x16xf32>
    %c25 = arith.constant 25 : index
    %c0_677 = arith.constant 0 : index
    %611 = vector.load %arg7[%c25, %c0_677] : memref<27x64xf32, #tpu.memory_space<vmem>>, vector<1x16xf32>
    tpu.vector_store %arg7[%c25, %c0_677], %610 {strides = array<i32>} : memref<27x64xf32, #tpu.memory_space<vmem>>, vector<1x16xf32>,
    %c1_i32_678 = arith.constant 1 : i32
    %612 = arith.addi %5, %c1_i32_678 : i32
    %c2_i32_679 = arith.constant 2 : i32
    %613 = arith.addi %612, %c2_i32_679 : i32
    %c0_680 = arith.constant 0 : index
    %c1_681 = arith.constant 1 : index
    %614 = arith.index_cast %613 : i32 to index
    %c2_682 = arith.constant 2 : index
    %615 = vector.load %arg3[%c0_680, %c1_681, %614, %c2_682] : memref<1x3x18x18xf32, #tpu.memory_space<vmem>>, vector<1x1x1x16xf32>
    %616 = vector.shape_cast %615 : vector<1x1x1x16xf32> to vector<1x16xf32>
    %c25_683 = arith.constant 25 : index
    %c16_684 = arith.constant 16 : index
    %617 = vector.load %arg7[%c25_683, %c16_684] : memref<27x64xf32, #tpu.memory_space<vmem>>, vector<1x16xf32>
    tpu.vector_store %arg7[%c25_683, %c16_684], %616 {strides = array<i32>} : memref<27x64xf32, #tpu.memory_space<vmem>>, vector<1x16xf32>,
    %c2_i32_685 = arith.constant 2 : i32
    %618 = arith.addi %5, %c2_i32_685 : i32
    %c2_i32_686 = arith.constant 2 : i32
    %619 = arith.addi %618, %c2_i32_686 : i32
    %c0_687 = arith.constant 0 : index
    %c1_688 = arith.constant 1 : index
    %620 = arith.index_cast %619 : i32 to index
    %c2_689 = arith.constant 2 : index
    %621 = vector.load %arg3[%c0_687, %c1_688, %620, %c2_689] : memref<1x3x18x18xf32, #tpu.memory_space<vmem>>, vector<1x1x1x16xf32>
    %622 = vector.shape_cast %621 : vector<1x1x1x16xf32> to vector<1x16xf32>
    %c25_690 = arith.constant 25 : index
    %c32_691 = arith.constant 32 : index
    %623 = vector.load %arg7[%c25_690, %c32_691] : memref<27x64xf32, #tpu.memory_space<vmem>>, vector<1x16xf32>
    tpu.vector_store %arg7[%c25_690, %c32_691], %622 {strides = array<i32>} : memref<27x64xf32, #tpu.memory_space<vmem>>, vector<1x16xf32>,
    %c3_i32_692 = arith.constant 3 : i32
    %624 = arith.addi %5, %c3_i32_692 : i32
    %c2_i32_693 = arith.constant 2 : i32
    %625 = arith.addi %624, %c2_i32_693 : i32
    %c0_694 = arith.constant 0 : index
    %c1_695 = arith.constant 1 : index
    %626 = arith.index_cast %625 : i32 to index
    %c2_696 = arith.constant 2 : index
    %627 = vector.load %arg3[%c0_694, %c1_695, %626, %c2_696] : memref<1x3x18x18xf32, #tpu.memory_space<vmem>>, vector<1x1x1x16xf32>
    %628 = vector.shape_cast %627 : vector<1x1x1x16xf32> to vector<1x16xf32>
    %c25_697 = arith.constant 25 : index
    %c48_698 = arith.constant 48 : index
    %629 = vector.load %arg7[%c25_697, %c48_698] : memref<27x64xf32, #tpu.memory_space<vmem>>, vector<1x16xf32>
    tpu.vector_store %arg7[%c25_697, %c48_698], %628 {strides = array<i32>} : memref<27x64xf32, #tpu.memory_space<vmem>>, vector<1x16xf32>,
    %c0_i32_699 = arith.constant 0 : i32
    %630 = arith.addi %5, %c0_i32_699 : i32
    %c2_i32_700 = arith.constant 2 : i32
    %631 = arith.addi %630, %c2_i32_700 : i32
    %c0_701 = arith.constant 0 : index
    %c2_702 = arith.constant 2 : index
    %632 = arith.index_cast %631 : i32 to index
    %c2_703 = arith.constant 2 : index
    %633 = vector.load %arg3[%c0_701, %c2_702, %632, %c2_703] : memref<1x3x18x18xf32, #tpu.memory_space<vmem>>, vector<1x1x1x16xf32>
    %634 = vector.shape_cast %633 : vector<1x1x1x16xf32> to vector<1x16xf32>
    %c26 = arith.constant 26 : index
    %c0_704 = arith.constant 0 : index
    %635 = vector.load %arg7[%c26, %c0_704] : memref<27x64xf32, #tpu.memory_space<vmem>>, vector<1x16xf32>
    tpu.vector_store %arg7[%c26, %c0_704], %634 {strides = array<i32>} : memref<27x64xf32, #tpu.memory_space<vmem>>, vector<1x16xf32>,
    %c1_i32_705 = arith.constant 1 : i32
    %636 = arith.addi %5, %c1_i32_705 : i32
    %c2_i32_706 = arith.constant 2 : i32
    %637 = arith.addi %636, %c2_i32_706 : i32
    %c0_707 = arith.constant 0 : index
    %c2_708 = arith.constant 2 : index
    %638 = arith.index_cast %637 : i32 to index
    %c2_709 = arith.constant 2 : index
    %639 = vector.load %arg3[%c0_707, %c2_708, %638, %c2_709] : memref<1x3x18x18xf32, #tpu.memory_space<vmem>>, vector<1x1x1x16xf32>
    %640 = vector.shape_cast %639 : vector<1x1x1x16xf32> to vector<1x16xf32>
    %c26_710 = arith.constant 26 : index
    %c16_711 = arith.constant 16 : index
    %641 = vector.load %arg7[%c26_710, %c16_711] : memref<27x64xf32, #tpu.memory_space<vmem>>, vector<1x16xf32>
    tpu.vector_store %arg7[%c26_710, %c16_711], %640 {strides = array<i32>} : memref<27x64xf32, #tpu.memory_space<vmem>>, vector<1x16xf32>,
    %c2_i32_712 = arith.constant 2 : i32
    %642 = arith.addi %5, %c2_i32_712 : i32
    %c2_i32_713 = arith.constant 2 : i32
    %643 = arith.addi %642, %c2_i32_713 : i32
    %c0_714 = arith.constant 0 : index
    %c2_715 = arith.constant 2 : index
    %644 = arith.index_cast %643 : i32 to index
    %c2_716 = arith.constant 2 : index
    %645 = vector.load %arg3[%c0_714, %c2_715, %644, %c2_716] : memref<1x3x18x18xf32, #tpu.memory_space<vmem>>, vector<1x1x1x16xf32>
    %646 = vector.shape_cast %645 : vector<1x1x1x16xf32> to vector<1x16xf32>
    %c26_717 = arith.constant 26 : index
    %c32_718 = arith.constant 32 : index
    %647 = vector.load %arg7[%c26_717, %c32_718] : memref<27x64xf32, #tpu.memory_space<vmem>>, vector<1x16xf32>
    tpu.vector_store %arg7[%c26_717, %c32_718], %646 {strides = array<i32>} : memref<27x64xf32, #tpu.memory_space<vmem>>, vector<1x16xf32>,
    %c3_i32_719 = arith.constant 3 : i32
    %648 = arith.addi %5, %c3_i32_719 : i32
    %c2_i32_720 = arith.constant 2 : i32
    %649 = arith.addi %648, %c2_i32_720 : i32
    %c0_721 = arith.constant 0 : index
    %c2_722 = arith.constant 2 : index
    %650 = arith.index_cast %649 : i32 to index
    %c2_723 = arith.constant 2 : index
    %651 = vector.load %arg3[%c0_721, %c2_722, %650, %c2_723] : memref<1x3x18x18xf32, #tpu.memory_space<vmem>>, vector<1x1x1x16xf32>
    %652 = vector.shape_cast %651 : vector<1x1x1x16xf32> to vector<1x16xf32>
    %c26_724 = arith.constant 26 : index
    %c48_725 = arith.constant 48 : index
    %653 = vector.load %arg7[%c26_724, %c48_725] : memref<27x64xf32, #tpu.memory_space<vmem>>, vector<1x16xf32>
    tpu.vector_store %arg7[%c26_724, %c48_725], %652 {strides = array<i32>} : memref<27x64xf32, #tpu.memory_space<vmem>>, vector<1x16xf32>,
    %c0_726 = arith.constant 0 : index
    %c0_727 = arith.constant 0 : index
    %654 = vector.load %arg4[%c0_726, %c0_727] : memref<32x27xf32, #tpu.memory_space<vmem>>, vector<32x27xf32>
    %c0_728 = arith.constant 0 : index
    %c0_729 = arith.constant 0 : index
    %655 = vector.load %arg7[%c0_728, %c0_729] : memref<27x64xf32, #tpu.memory_space<vmem>>, vector<27x64xf32>
    %cst = arith.constant dense<0.000000e+00> : vector<32x64xf32>
    %656 = tpu.matmul %654, %655, %cst {dimension_numbers = #tpu.dot_dimension_numbers<[1], [0], [0], [1], [0, 0, 1, 1], [], []>} : vector<32x27xf32>, vector<27x64xf32>, vector<32x64xf32> -> vector<32x64xf32>
    %c0_730 = arith.constant 0 : index
    %c0_731 = arith.constant 0 : index
    %657 = vector.load %arg5[%c0_730, %c0_731] : memref<32x1xf32, #tpu.memory_space<vmem>>, vector<32x1xf32>
    %658 = vector.broadcast %657 : vector<32x1xf32> to vector<32x64xf32>
    %659 = arith.addf %656, %658 : vector<32x64xf32>
    %cst_732 = arith.constant 0.000000e+00 : f32
    %660 = vector.broadcast %cst_732 : f32 to vector<32x64xf32>
    %661 = arith.maximumf %659, %660 : vector<32x64xf32>
    %cst_733 = arith.constant dense<0.000000e+00> : vector<32xf32>
    %662 = vector.multi_reduction <add>, %661, %cst_733 [1] : vector<32x64xf32> to vector<32xf32>
    %663 = vector.shape_cast %662 : vector<32xf32> to vector<32x1xf32>
    %c0_734 = arith.constant 0 : index
    %c0_735 = arith.constant 0 : index
    %c0_736 = arith.constant 0 : index
    %c0_737 = arith.constant 0 : index
    %664 = vector.load %arg6[%c0_734, %c0_735, %c0_736, %c0_737] : memref<1x1x32x1xf32, #tpu.memory_space<vmem>>, vector<1x1x32x1xf32>
    %665 = vector.shape_cast %664 : vector<1x1x32x1xf32> to vector<32x1xf32>
    %666 = arith.addf %665, %663 : vector<32x1xf32>
    %c0_738 = arith.constant 0 : index
    %c0_739 = arith.constant 0 : index
    %c0_740 = arith.constant 0 : index
    %c0_741 = arith.constant 0 : index
    %667 = vector.load %arg6[%c0_738, %c0_739, %c0_740, %c0_741] : memref<1x1x32x1xf32, #tpu.memory_space<vmem>>, vector<1x1x32x1xf32>
    %668 = vector.shape_cast %667 : vector<1x1x32x1xf32> to vector<32x1xf32>
    %669 = vector.shape_cast %666 : vector<32x1xf32> to vector<1x1x32x1xf32>
    tpu.vector_store %arg6[%c0_738, %c0_739, %c0_740, %c0_741], %669 {strides = array<i32>} : memref<1x1x32x1xf32, #tpu.memory_space<vmem>>, vector<1x1x32x1xf32>,
    return
  }
  func.func @transform_0(%arg0: i32, %arg1: i32, %arg2: i32) -> (i32, i32, i32, i32) {
    %c0_i32 = arith.constant 0 : i32
    %c0_i32_0 = arith.constant 0 : i32
    %c0_i32_1 = arith.constant 0 : i32
    %c0_i32_2 = arith.constant 0 : i32
    return %arg0, %c0_i32, %c0_i32_0, %c0_i32_1 : i32, i32, i32, i32
  }
  func.func @transform_1(%arg0: i32, %arg1: i32, %arg2: i32) -> (i32, i32) {
    %c0_i32 = arith.constant 0 : i32
    %c0_i32_0 = arith.constant 0 : i32
    %c0_i32_1 = arith.constant 0 : i32
    return %c0_i32, %c0_i32_0 : i32, i32
  }
  func.func @transform_2(%arg0: i32, %arg1: i32, %arg2: i32) -> (i32, i32) {
    %c0_i32 = arith.constant 0 : i32
    %c0_i32_0 = arith.constant 0 : i32
    %c0_i32_1 = arith.constant 0 : i32
    return %c0_i32, %c0_i32_0 : i32, i32
  }
  func.func @transform_3(%arg0: i32, %arg1: i32, %arg2: i32) -> (i32, i32, i32, i32) {
    %c0_i32 = arith.constant 0 : i32
    %c0_i32_0 = arith.constant 0 : i32
    %c0_i32_1 = arith.constant 0 : i32
    return %arg0, %arg1, %c0_i32, %c0_i32_0 : i32, i32, i32, i32
  }
}

</mosaic_0001>

<bundles_post_ra>
// kernel: tpu_custom_call.1
= control target key start
LH: loop header
LB: loop body
LE: loop exit
PB: predicated region body
PF: predicated region fallthrough
CT: control target
= control target key end

     0   :  { %s1557_s12 = smov 0   ;;  %s1559_s13 = smov 0   ;;  %s1994_s0 = inlined_call_operand.vmem [shape: f32[2,3,18,18], index: 0, kind: input, shape index: {}]   ;;  %s1995_s1 = inlined_call_operand.vmem [shape: f32[32,27], index: 1, kind: input, shape index: {}]   ;;  %s1996_s2 = inlined_call_operand.vmem [shape: f32[32,1], index: 2, kind: input, shape index: {}]   ;;  %s1997_s3 = inlined_call_operand.vmem [shape: f32[2,2,32,1], index: 3, kind: output, shape index: {}]  }
   0x1   :  { %s1561_s14 = smov 0   ;;  %s1563_s15 = smov 0  }
   0x2   :  { %s1565_s16 = smov 0   ;;  %s1567_s17 = smov 0  }
   0x3   :  { %s1569_s18 = smov 0  }
   0x4 LB: > { %s25_s19 = sadd.s32 1, %s1510_s15  ;;  %s28_s20 = sadd.s32 1, %s1514_s16  ;;  %s1522_s18 = sphi %s1569_s18, %s13_s18   ;;  %s1518_s17 = sphi %s1567_s17, %s2003_s17   ;;  %s1514_s16 = sphi %s1565_s16, %s2002_s16   ;;  %s1510_s15 = sphi %s1563_s15, %s2001_s15   ;;  %s1506_s14 = sphi %s1561_s14, %s2000_s14   ;;  %s1502_s13 = sphi %s1559_s13, %s1999_s13   ;;  %s1498_s12 = sphi %s1557_s12, %s1998_s12  }
   0x5   : > { %p26_p0 = scmp.ge.s32.totalorder %s25_s19, 2  ;;  %p1212_p1 = scmp.ge.s32.totalorder %s1522_s18, 1 }
   0x6   : > { %p158_p2 = scmp.lt.s32.totalorder %s1522_s18, 9  ;;  %s32_s21 = sadd.s32 1, %s1518_s17 }
   0x7   : > { %s2005_s19 = smov (%p26_p0, %s25_s19), 0  ;;  %s2007_s20 = smov (!%p26_p0, %s28_s20), %s1514_s16 }
   0x8   : > { %p159_p3 = pnand %p1212_p1, %p158_p2  ;;  %p30_p4 = scmp.ge.s32.totalorder %s2007_s20, 2 }
   0x9   : > { %p186_p6 = scmp.lt.s32.totalorder (!%p159_p3), %s1506_s14, 1  ;;  %p193_p7 = scmp.lt.s32.totalorder (!%p159_p3), %s1502_s13, 1 }
   0xa   : > { %s2009_s20 = smov (%p30_p4, %s2007_s20), 0  ;;  %s2011_s21 = smov (!%p30_p4, %s32_s21), %s1518_s17 }
   0xb   : > { %p34_p5 = scmp.ge.s32.totalorder %s2011_s21, 2  ;;  %162 = sbr.rel (%p159_p3) target bundleno = 703 (0x2bf), region = 32 }
   0xc   : > { %p1217_p8 = scmp.ne.s32.totalorder (!%p159_p3), %s1498_s12, 0 }
   0xd   : > { %s2013_s21 = smov (%p34_p5, %s2011_s21), 0 }
  0x10   : > { %s2015_s14 = smov (!%p186_p6, %s1506_s14), 1 }
  0x11   : > { %s194_s22 = scalar_select %p193_p7, %s1502_s13, 1 }
  0x12   : > { %s1396_s23 = smul.u32 72, %s2015_s14  ;;  %s1215_s24 = sshll.u32 %s2015_s14, 3 }
  0x13   : > { %s1214_s25 = sshll.u32 %s194_s22, 2  ;;  %203 = sbr.rel (%p1217_p8) target bundleno = 27 (0x1b), region = 36 }
  0x14   : > { %s190_s28 = scalar_lea.vmem %s1994_s0, %s1396_s23  ;;  %s197_s29 = sadd.s32 %s1215_s24, %s1214_s25 }
  0x15   : > { %s1216_s30 = sshll.u32 %s197_s29, 3 }
  0x16   : > { %s1611_s6 = scalar_lea.vmem %s1997_s3, %s1216_s30 }
  0x18   : > { %vm204_vm0 = vcmask 7168   ;;  %v1524_v0 = vmov 0.0  }
  0x19   : > { %205 = vst.msk [vmem:[%s1611_s6] sm:$0xff] %vm204_vm0, %v1524_v0  ;;  %206 = vst.msk [vmem:[%s1611_s6 + $0x8] sm:$0xff] %vm204_vm0, %v1524_v0 }
  0x1a   : > { %207 = vst.msk [vmem:[%s1611_s6 + $0x10] sm:$0xff] %vm204_vm0, %v1524_v0  ;;  %208 = vst.msk [vmem:[%s1611_s6 + $0x18] sm:$0xff] %vm204_vm0, %v1524_v0 }
  0x1b PF: > { %s1218_s7 = sshll.u32 %s1502_s13, 1  ;;  %s1525_s11 = smov 126   ;;  %vm214_vm1 = vcmask 122880   ;;  %vm223_vm2 = vcmask 254080   ;;  %vm232_vm3 = vcmask 385280   ;;  %vm241_vm4 = vcmask 516480  }
  0x1c   : > { %s210_s8 = sadd.s32 %s1498_s12, %s1218_s7  ;;  %s1526_s12 = smov 14   ;;  %vm908_vm5 = vcmask 1042432   ;;  %vm895_vm6 = vcmask 220160   ;;  %vm1001_vm7 = vcmask 523264   ;;  %vm1022_vm8 = vcmask 7168  }
  0x1d   : > { %s1219_s9 = sshll.u32 %s210_s8, 2  ;;  %s1527_s13 = smov 127  }
  0x1e   : > { %s1620_s10 = scalar_lea.vmem %s190_s28, %s1219_s9  ;;  %s1528_s14 = smov 30  }
  0x1f   : > { %v1355_v1 = vld [vmem:[%s1620_s10 + $0x32] sm:$0x1]  ;;  %v1347_v2 = vld [vmem:[%s1620_s10 + $0x2] sm:$0x1]  ;;  %v1348_v3 = vld [vmem:[%s1620_s10 + $0x3] sm:$0x1] }
  0x20   : > { %841 = vrot.lane.b32.xlu1 %v1355_v1, %s1525_s11  ;;  %793 = vrot.lane.b32.xlu0 %v1347_v2, %s1525_s11  ;;  %v1351_v4 = vld [vmem:[%s1620_s10 + $0x1a] sm:$0x1]  ;;  %v1356_v5 = vld [vmem:[%s1620_s10 + $0x33] sm:$0x1]  ;;  %s1529_s22 = smov 16   ;;  %s1530_s23 = smov 15  }
  0x21   : > { %v1352_v6 = vld [vmem:[%s1620_s10 + $0x1b] sm:$0x1]  ;;  %v1313_v7 = vld [vmem:[%s1620_s10 + $0x31] sm:$0x1]  ;;  %v1309_v8 = vld [vmem:[%s1620_s10 + $0x19] sm:$0x1] }
  0x22   : > { %v1339_v9 = vld [vmem:[%s1620_s10 + $0x1a] sm:$0x1]  ;;  %v1335_v10 = vld [vmem:[%s1620_s10 + $0x2] sm:$0x1]  ;;  %v1349_v11 = vld [vmem:[%s1620_s10 + $0x4] sm:$0x1] }
  0x23   : > { %v1343_v12 = vld [vmem:[%s1620_s10 + $0x32] sm:$0x1]  ;;  %v1357_v13 = vld [vmem:[%s1620_s10 + $0x34] sm:$0x1]  ;;  %v1353_v14 = vld [vmem:[%s1620_s10 + $0x1c] sm:$0x1] }
  0x24   : > { %799 = vrot.lane.b32.xlu1 %v1348_v3, %s1526_s12  ;;  %817 = vrot.lane.b32.xlu0 %v1351_v4, %s1525_s11  ;;  %v1314_v15 = vld [vmem:[%s1620_s10 + $0x32] sm:$0x1]  ;;  %v1310_v16 = vld [vmem:[%s1620_s10 + $0x1a] sm:$0x1]  ;;  %s1531_s24 = smov 46   ;;  %s1532_s25 = smov 32  }
  0x25   : > { %v1323_v17 = vld [vmem:[%s1620_s10 + $0x1a] sm:$0x1]  ;;  %v1317_v18 = vld [vmem:[%s1620_s10 + $0x2] sm:$0x1]  ;;  %v1329_v19 = vld [vmem:[%s1620_s10 + $0x32] sm:$0x1] }
  0x26   : > { %676 = vst.msk [vmem:[#allocation2 + $0x13] sm:$0x1] %vm214_vm1, %v1323_v17  ;;  %654 = vst.msk [vmem:[#allocation2 + $0x12] sm:$0x1] %vm214_vm1, %v1317_v18  ;;  %v1324_v20 = vld [vmem:[%s1620_s10 + $0x1b] sm:$0x1] }
  0x27   : > { %698 = vst.msk [vmem:[#allocation2 + $0x14] sm:$0x1] %vm214_vm1, %v1329_v19  ;;  %v1318_v21 = vld [vmem:[%s1620_s10 + $0x3] sm:$0x1]  ;;  %v1330_v23 = vld [vmem:[%s1620_s10 + $0x33] sm:$0x1] }
  0x28   : > { %847 = vrot.lane.b32.xlu1 %v1356_v5, %s1526_s12  ;;  %823 = vrot.lane.b32.xlu0 %v1352_v6, %s1526_s12  ;;  %v1336_v22 = vld [vmem:[%s1620_s10 + $0x3] sm:$0x1]  ;;  %v1344_v24 = vld [vmem:[%s1620_s10 + $0x33] sm:$0x1]  ;;  %s1533_s26 = smov 31   ;;  %s1534_s27 = smov 48  }
  0x29   : > { %v1340_v25 = vld [vmem:[%s1620_s10 + $0x1b] sm:$0x1]  ;;  %v1354_v26 = vld [vmem:[%s1620_s10 + $0x1d] sm:$0x1]  ;;  %v1350_v27 = vld [vmem:[%s1620_s10 + $0x5] sm:$0x1] }
  0x2a   : > { %v1358_v28 = vld [vmem:[%s1620_s10 + $0x35] sm:$0x1]  ;;  %v1271_v29 = vld [vmem:[%s1620_s10 + $0x30] sm:$0x1]  ;;  %v1293_v30 = vld [vmem:[%s1620_s10 + $0x1] sm:$0x1] }
  0x2b   : > { %v1297_v31 = vld [vmem:[%s1620_s10 + $0x19] sm:$0x1]  ;;  %v1301_v32 = vld [vmem:[%s1620_s10 + $0x31] sm:$0x1]  ;;  %v1305_v33 = vld [vmem:[%s1620_s10 + $0x1] sm:$0x1] }
  0x2c   : > { %631 = vrot.lane.b32.xlu1 %v1313_v7, %s1525_s11  ;;  %607 = vrot.lane.b32.xlu0 %v1309_v8, %s1525_s11  ;;  %v1311_v34 = vld [vmem:[%s1620_s10 + $0x1b] sm:$0x1]  ;;  %v1315_v35 = vld [vmem:[%s1620_s10 + $0x33] sm:$0x1]  ;;  %s1535_s28 = smov 47  }
  0x2d   : > { %v1319_v36 = vld [vmem:[%s1620_s10 + $0x4] sm:$0x1]  ;;  %v1325_v37 = vld [vmem:[%s1620_s10 + $0x1c] sm:$0x1]  ;;  %v1275_v38 = vld [vmem:[%s1620_s10 + $0x1] sm:$0x1] }
  0x2e   : > { %444 = vst.msk [vmem:[#allocation2 + $0x9] sm:$0x1] %vm214_vm1, %v1275_v38  ;;  %v1331_v39 = vld [vmem:[%s1620_s10 + $0x34] sm:$0x1]  ;;  %v1337_v40 = vld [vmem:[%s1620_s10 + $0x4] sm:$0x1] }
  0x2f   : > { %v1281_v41 = vld [vmem:[%s1620_s10 + $0x19] sm:$0x1]  ;;  %v1287_v42 = vld [vmem:[%s1620_s10 + $0x31] sm:$0x1]  ;;  %v1341_v43 = vld [vmem:[%s1620_s10 + $0x1c] sm:$0x1] }
  0x30   : > { %745 = vrot.lane.b32.xlu1 %v1339_v9, %s1527_s13  ;;  %721 = vrot.lane.b32.xlu0 %v1335_v10, %s1527_s13  ;;  %466 = vst.msk [vmem:[#allocation2 + $0xa] sm:$0x1] %vm214_vm1, %v1281_v41  ;;  %488 = vst.msk [vmem:[#allocation2 + $0xb] sm:$0x1] %vm214_vm1, %v1287_v42  ;;  %v1345_v44 = vld [vmem:[%s1620_s10 + $0x34] sm:$0x1] }
  0x31   : > { %v1272_v45 = vld [vmem:[%s1620_s10 + $0x31] sm:$0x1]  ;;  %v1276_v46 = vld [vmem:[%s1620_s10 + $0x2] sm:$0x1]  ;;  %v1282_v47 = vld [vmem:[%s1620_s10 + $0x1a] sm:$0x1] }
  0x32   : > { %v1288_v48 = vld [vmem:[%s1620_s10 + $0x32] sm:$0x1]  ;;  %v1294_v49 = vld [vmem:[%s1620_s10 + $0x2] sm:$0x1]  ;;  %v1298_v50 = vld [vmem:[%s1620_s10 + $0x1a] sm:$0x1] }
  0x33   : > { %v1302_v51 = vld [vmem:[%s1620_s10 + $0x32] sm:$0x1]  ;;  %v1306_v52 = vld [vmem:[%s1620_s10 + $0x2] sm:$0x1]  ;;  %v1312_v53 = vld [vmem:[%s1620_s10 + $0x1c] sm:$0x1] }
  0x34   : > { %805 = vrot.lane.b32.xlu1 %v1349_v11, %s1528_s14  ;;  %769 = vrot.lane.b32.xlu0 %v1343_v12, %s1527_s13  ;;  %v1316_v54 = vld [vmem:[%s1620_s10 + $0x34] sm:$0x1]  ;;  %v1322_v55 = vld [vmem:[%s1620_s10 + $0x5] sm:$0x1] }
  0x35   : > { %v1328_v56 = vld [vmem:[%s1620_s10 + $0x1d] sm:$0x1]  ;;  %v1334_v57 = vld [vmem:[%s1620_s10 + $0x35] sm:$0x1]  ;;  %v1338_v58 = vld [vmem:[%s1620_s10 + $0x5] sm:$0x1] }
  0x36   : > { %v1342_v59 = vld [vmem:[%s1620_s10 + $0x1d] sm:$0x1]  ;;  %v1346_v60 = vld [vmem:[%s1620_s10 + $0x35] sm:$0x1]  ;;  %v299_v61 = vld [vmem:[%s1620_s10] sm:$0x1] }
  0x37   : > { %v1256_v62 = vld [vmem:[%s1620_s10 + $0x18] sm:$0x1]  ;;  %v1260_v63 = vld [vmem:[%s1620_s10 + $0x30] sm:$0x1]  ;;  %v371_v0 = vld [vmem:[%s1620_s10] sm:$0x1] }
  0x38   : > { %853 = vrot.lane.b32.xlu1 %v1357_v13, %s1528_s14  ;;  %829 = vrot.lane.b32.xlu0 %v1353_v14, %s1528_s14  ;;  %v1267_v1 = vld [vmem:[%s1620_s10 + $0x18] sm:$0x1]  ;;  %v1273_v2 = vld [vmem:[%s1620_s10 + $0x32] sm:$0x1] }
  0x39   : > { %v1277_v5 = vld [vmem:[%s1620_s10 + $0x3] sm:$0x1]  ;;  %v1283_v6 = vld [vmem:[%s1620_s10 + $0x1b] sm:$0x1]  ;;  %v1289_v9 = vld [vmem:[%s1620_s10 + $0x33] sm:$0x1] }
  0x3a   : > { %v1295_v10 = vld [vmem:[%s1620_s10 + $0x3] sm:$0x1]  ;;  %v1231_v13 = vld [vmem:[%s1620_s10 + $0x18] sm:$0x1]  ;;  %v213_v14 = vld [vmem:[%s1620_s10] sm:$0x1] }
  0x3b   : > { %246 = vst.msk [vmem:[#allocation2 + $0x1] sm:$0x1] %vm214_vm1, %v1231_v13  ;;  %215 = vst.msk [vmem:[#allocation2] sm:$0x1] %vm214_vm1, %v213_v14  ;;  %v1243_v19 = vld [vmem:[%s1620_s10 + $0x30] sm:$0x1] }
  0x3c   : > { %637 = vrot.lane.b32.xlu1 %v1314_v15, %s1526_s12  ;;  %613 = vrot.lane.b32.xlu0 %v1310_v16, %s1526_s12  ;;  %v1299_v15 = vld [vmem:[%s1620_s10 + $0x1b] sm:$0x1]  ;;  %v1303_v16 = vld [vmem:[%s1620_s10 + $0x33] sm:$0x1]  ;;  %274 = vst.msk [vmem:[#allocation2 + $0x2] sm:$0x1] %vm214_vm1, %v1243_v19 }
  0x3d   : > { %v1286_v41 = vld [vmem:[%s1620_s10 + $0x1c] sm:$0x1]  ;;  %v1263_v19 = vld [vmem:[%s1620_s10 + $0x33] sm:$0x1] }
  0x40   : > { %679 = vrot.lane.b32.xlu1 %v1324_v20, %s1529_s22  ;;  %657 = vrot.lane.b32.xlu0 %v1318_v21, %s1529_s22  ;;  %v1307_v20 = vld [vmem:[%s1620_s10 + $0x3] sm:$0x1]  ;;  %v1222_v21 = vld [vmem:[%s1620_s10 + $0x1] sm:$0x1] }
  0x44   : > { %727 = vrot.lane.b32.xlu1 %v1336_v22, %s1530_s23  ;;  %701 = vrot.lane.b32.xlu0 %v1330_v23, %s1529_s22 }
  0x48   : > { %775 = vrot.lane.b32.xlu1 %v1344_v24, %s1530_s23  ;;  %751 = vrot.lane.b32.xlu0 %v1340_v25, %s1530_s23  ;;  %v1234_v24 = vld [vmem:[%s1620_s10 + $0x19] sm:$0x1]  ;;  %v1246_v25 = vld [vmem:[%s1620_s10 + $0x31] sm:$0x1] }
  0x4c   : > { %835 = vrot.lane.b32.xlu1 %v1354_v26, %s1531_s24  ;;  %811 = vrot.lane.b32.xlu0 %v1350_v27, %s1531_s24 }
  0x50   : > { %859 = vrot.lane.b32.xlu0 %v1358_v28, %s1531_s24  ;;  %421 = vrot.lane.b32.xlu1 %v1271_v29, %s1525_s11  ;;  %v1253_v28 = vld [vmem:[%s1620_s10 + $0x1] sm:$0x1]  ;;  %v1257_v29 = vld [vmem:[%s1620_s10 + $0x19] sm:$0x1] }
  0x54   : > { %511 = vrot.lane.b32.xlu0 %v1293_v30, %s1527_s13  ;;  %535 = vrot.lane.b32.xlu1 %v1297_v31, %s1527_s13 }
  0x58   : > { %559 = vrot.lane.b32.xlu0 %v1301_v32, %s1527_s13  ;;  %583 = vrot.lane.b32.xlu1 %v1305_v33, %s1525_s11  ;;  %v1261_v32 = vld [vmem:[%s1620_s10 + $0x31] sm:$0x1]  ;;  %v1264_v33 = vld [vmem:[%s1620_s10 + $0x1] sm:$0x1] }
  0x5c   : > { %619 = vrot.lane.b32.xlu0 %v1311_v34, %s1528_s14  ;;  %643 = vrot.lane.b32.xlu1 %v1315_v35, %s1528_s14 }
  0x60   : > { %663 = vrot.lane.b32.xlu0 %v1319_v36, %s1532_s25  ;;  %685 = vrot.lane.b32.xlu1 %v1325_v37, %s1532_s25  ;;  %v1268_v36 = vld [vmem:[%s1620_s10 + $0x19] sm:$0x1]  ;;  %v1274_v37 = vld [vmem:[%s1620_s10 + $0x33] sm:$0x1] }
  0x64   : > { %707 = vrot.lane.b32.xlu0 %v1331_v39, %s1532_s25  ;;  %733 = vrot.lane.b32.xlu1 %v1337_v40, %s1533_s26  ;;  %v1280_v40 = vld [vmem:[%s1620_s10 + $0x4] sm:$0x1] }
  0x68   : > { %757 = vrot.lane.b32.xlu0 %v1341_v43, %s1533_s26  ;;  %781 = vrot.lane.b32.xlu1 %v1345_v44, %s1533_s26  ;;  %v1292_v44 = vld [vmem:[%s1620_s10 + $0x34] sm:$0x1] }
  0x6c   : > { %427 = vrot.lane.b32.xlu0 %v1272_v45, %s1526_s12  ;;  %447 = vrot.lane.b32.xlu1 %v1276_v46, %s1529_s22  ;;  %v1296_v45 = vld [vmem:[%s1620_s10 + $0x4] sm:$0x1] }
  0x70   : > { %469 = vrot.lane.b32.xlu0 %v1282_v47, %s1529_s22  ;;  %491 = vrot.lane.b32.xlu1 %v1288_v48, %s1529_s22  ;;  %v1300_v48 = vld [vmem:[%s1620_s10 + $0x1c] sm:$0x1] }
  0x74   : > { %517 = vrot.lane.b32.xlu0 %v1294_v49, %s1530_s23  ;;  %541 = vrot.lane.b32.xlu1 %v1298_v50, %s1530_s23  ;;  %v1304_v49 = vld [vmem:[%s1620_s10 + $0x34] sm:$0x1] }
  0x78   : > { %565 = vrot.lane.b32.xlu0 %v1302_v51, %s1530_s23  ;;  %589 = vrot.lane.b32.xlu1 %v1306_v52, %s1526_s12  ;;  %v1308_v52 = vld [vmem:[%s1620_s10 + $0x4] sm:$0x1] }
  0x7c   : > { %625 = vrot.lane.b32.xlu0 %v1312_v53, %s1531_s24  ;;  %649 = vrot.lane.b32.xlu1 %v1316_v54, %s1531_s24  ;;  %v1225_v53 = vld [vmem:[%s1620_s10 + $0x2] sm:$0x1] }
  0x80   : > { %671 = vrot.lane.b32.xlu0 %v1322_v55, %s1534_s27  ;;  %693 = vrot.lane.b32.xlu1 %v1328_v56, %s1534_s27  ;;  %v1237_v56 = vld [vmem:[%s1620_s10 + $0x1a] sm:$0x1] }
  0x84   : > { %715 = vrot.lane.b32.xlu0 %v1334_v57, %s1534_s27  ;;  %739 = vrot.lane.b32.xlu1 %v1338_v58, %s1535_s28  ;;  %v1249_v57 = vld [vmem:[%s1620_s10 + $0x32] sm:$0x1] }
  0x88   : > { %763 = vrot.lane.b32.xlu0 %v1342_v59, %s1535_s28  ;;  %787 = vrot.lane.b32.xlu1 %v1346_v60, %s1535_s28 }
  0x8c   : > { %301 = vrot.lane.b32.xlu0 %v299_v61, %s1527_s13  ;;  %325 = vrot.lane.b32.xlu1 %v1256_v62, %s1527_s13 }
  0x90   : > { %349 = vrot.lane.b32.xlu0 %v1260_v63, %s1527_s13  ;;  %373 = vrot.lane.b32.xlu1 %v371_v0, %s1525_s11  ;;  %v1254_v63 = vld [vmem:[%s1620_s10 + $0x2] sm:$0x1]  ;;  %v1258_v0 = vld [vmem:[%s1620_s10 + $0x1a] sm:$0x1] }
  0x92   : > { %v842_v3 = vpop.permute.xlu1 %841  ;;  %v794_v4 = vpop.permute.xlu0 %793 }
  0x93   : > { %844 = vst.msk [vmem:[#allocation2 + $0x1a] sm:$0x1] %vm214_vm1, %v842_v3  ;;  %796 = vst.msk [vmem:[#allocation2 + $0x18] sm:$0x1] %vm214_vm1, %v794_v4  ;;  %v1262_v3 = vld [vmem:[%s1620_s10 + $0x32] sm:$0x1] }
  0x94   : > { %397 = vrot.lane.b32.xlu0 %v1267_v1, %s1525_s11  ;;  %433 = vrot.lane.b32.xlu1 %v1273_v2, %s1528_s14  ;;  %v1265_v4 = vld [vmem:[%s1620_s10 + $0x2] sm:$0x1] }
  0x96   : > { %v800_v7 = vpop.permute.xlu1 %799  ;;  %v818_v8 = vpop.permute.xlu0 %817 }
  0x97   : > { %802 = vst.msk [vmem:[#allocation2 + $0x18] sm:$0x1] %vm223_vm2, %v800_v7  ;;  %v1269_v7 = vld [vmem:[%s1620_s10 + $0x1a] sm:$0x1] }
  0x98   : > { %820 = vst.msk [vmem:[#allocation2 + $0x19] sm:$0x1] %vm214_vm1, %v818_v8  ;;  %453 = vrot.lane.b32.xlu0 %v1277_v5, %s1532_s25  ;;  %475 = vrot.lane.b32.xlu1 %v1283_v6, %s1532_s25  ;;  %v1228_v8 = vld [vmem:[%s1620_s10 + $0x3] sm:$0x1] }
  0x9a   : > { %v848_v11 = vpop.permute.xlu1 %847  ;;  %v824_v12 = vpop.permute.xlu0 %823 }
  0x9b   : > { %850 = vst.msk [vmem:[#allocation2 + $0x1a] sm:$0x1] %vm223_vm2, %v848_v11  ;;  %826 = vst.msk [vmem:[#allocation2 + $0x19] sm:$0x1] %vm223_vm2, %v824_v12  ;;  %v1240_v11 = vld [vmem:[%s1620_s10 + $0x1b] sm:$0x1] }
  0x9c   : > { %497 = vrot.lane.b32.xlu0 %v1289_v9, %s1532_s25  ;;  %523 = vrot.lane.b32.xlu1 %v1295_v10, %s1533_s26  ;;  %v1252_v12 = vld [vmem:[%s1620_s10 + $0x33] sm:$0x1] }
  0x9e   : > { %v632_v17 = vpop.permute.xlu1 %631  ;;  %v608_v18 = vpop.permute.xlu0 %607 }
  0x9f   : > { %634 = vst.msk [vmem:[#allocation2 + $0x11] sm:$0x1] %vm214_vm1, %v632_v17  ;;  %610 = vst.msk [vmem:[#allocation2 + $0x10] sm:$0x1] %vm214_vm1, %v608_v18 }
  0xa0   : > { %547 = vrot.lane.b32.xlu0 %v1299_v15, %s1533_s26  ;;  %571 = vrot.lane.b32.xlu1 %v1303_v16, %s1533_s26  ;;  %v1255_v15 = vld [vmem:[%s1620_s10 + $0x3] sm:$0x1]  ;;  %v1259_v16 = vld [vmem:[%s1620_s10 + $0x1b] sm:$0x1] }
  0xa2   : > { %v746_v22 = vpop.permute.xlu1 %745  ;;  %v722_v23 = vpop.permute.xlu0 %721 }
  0xa3   : > { %748 = vst.msk [vmem:[#allocation2 + $0x16] sm:$0x1] %vm214_vm1, %v746_v22  ;;  %724 = vst.msk [vmem:[#allocation2 + $0x15] sm:$0x1] %vm214_vm1, %v722_v23  ;;  %v865_v22 = vld [vmem:[%s1995_s1 + $0x10] sm:$0xff] }
  0xa4   : > { %595 = vrot.lane.b32.xlu0 %v1307_v20, %s1528_s14  ;;  %220 = vrot.lane.b32.xlu1 %v1222_v21, %s1529_s22  ;;  %v1266_v20 = vld [vmem:[%s1620_s10 + $0x3] sm:$0x1] }
  0xa5   : > { %v863_v21 = vld [vmem:[%s1995_s1] sm:$0xff]  ;;  %1385 = vmatprep.mubr.msk.f32.mxu1 %vm895_vm6, %v865_v22 }
  0xa6   : > { %v806_v26 = vpop.permute.xlu1 %805  ;;  %v770_v27 = vpop.permute.xlu0 %769  ;;  %1382 = vmatprep.mubr.msk.f32.mxu0 %vm895_vm6, %v863_v21 }
  0xa7   : > { %808 = vst.msk [vmem:[#allocation2 + $0x18] sm:$0x1] %vm232_vm3, %v806_v26  ;;  %v871_v26 = vld [vmem:[%s1996_s2] sm:$0xff] }
  0xa8   : > { %772 = vst.msk [vmem:[#allocation2 + $0x17] sm:$0x1] %vm214_vm1, %v770_v27  ;;  %251 = vrot.lane.b32.xlu0 %v1234_v24, %s1529_s22  ;;  %279 = vrot.lane.b32.xlu1 %v1246_v25, %s1529_s22  ;;  %v1270_v25 = vld [vmem:[%s1620_s10 + $0x1b] sm:$0x1]  ;;  %v1536_v27 = vmov 0  }
  0xa9   : > { %1466 = vset.pattern.permute.xlu1 %v1536_v27  ;;  %1467 = vset.pattern.permute.xlu0 %v1536_v27  ;;  %v864_v27 = vld [vmem:[%s1995_s1 + $0x8] sm:$0xff] }
  0xaa   : > { %v854_v30 = vpop.permute.xlu1 %853  ;;  %v830_v31 = vpop.permute.xlu0 %829 }
  0xab   : > { %856 = vst.msk [vmem:[#allocation2 + $0x1a] sm:$0x1] %vm232_vm3, %v854_v30  ;;  %832 = vst.msk [vmem:[#allocation2 + $0x19] sm:$0x1] %vm232_vm3, %v830_v31  ;;  %v873_v30 = vld [vmem:[%s1996_s2 + $0x10] sm:$0xff]  ;;  %v872_v31 = vld [vmem:[%s1996_s2 + $0x8] sm:$0xff] }
  0xac   : > { %307 = vrot.lane.b32.xlu0 %v1253_v28, %s1530_s23  ;;  %331 = vrot.lane.b32.xlu1 %v1257_v29, %s1530_s23 }
  0xae   : > { %v638_v34 = vpop.permute.xlu1 %637  ;;  %v614_v35 = vpop.permute.xlu0 %613 }
  0xaf   : > { %640 = vst.msk [vmem:[#allocation2 + $0x11] sm:$0x1] %vm223_vm2, %v638_v34  ;;  %616 = vst.msk [vmem:[#allocation2 + $0x10] sm:$0x1] %vm223_vm2, %v614_v35  ;;  %v874_v34 = vld [vmem:[%s1996_s2 + $0x18] sm:$0xff] }
  0xb0   : > { %355 = vrot.lane.b32.xlu0 %v1261_v32, %s1530_s23  ;;  %379 = vrot.lane.b32.xlu1 %v1264_v33, %s1526_s12 }
  0xb2   : > { %v680_v38 = vpop.permute.xlu1 %679  ;;  %v658_v39 = vpop.permute.xlu0 %657 }
  0xb3   : > { %682 = vst.msk [vmem:[#allocation2 + $0x13] sm:$0x1] %vm223_vm2, %v680_v38  ;;  %660 = vst.msk [vmem:[#allocation2 + $0x12] sm:$0x1] %vm223_vm2, %v658_v39 }
  0xb4   : > { %403 = vrot.lane.b32.xlu0 %v1268_v36, %s1526_s12  ;;  %439 = vrot.lane.b32.xlu1 %v1274_v37, %s1531_s24 }
  0xb6   : > { %v728_v42 = vpop.permute.xlu1 %727  ;;  %v702_v43 = vpop.permute.xlu0 %701 }
  0xb7   : > { %730 = vst.msk [vmem:[#allocation2 + $0x15] sm:$0x1] %vm223_vm2, %v728_v42  ;;  %704 = vst.msk [vmem:[#allocation2 + $0x14] sm:$0x1] %vm223_vm2, %v702_v43 }
  0xb8   : > { %461 = vrot.lane.b32.xlu0 %v1280_v40, %s1534_s27  ;;  %483 = vrot.lane.b32.xlu1 %v1286_v41, %s1534_s27 }
  0xba   : > { %v776_v46 = vpop.permute.xlu1 %775  ;;  %v752_v47 = vpop.permute.xlu0 %751 }
  0xbb   : > { %778 = vst.msk [vmem:[#allocation2 + $0x17] sm:$0x1] %vm223_vm2, %v776_v46  ;;  %754 = vst.msk [vmem:[#allocation2 + $0x16] sm:$0x1] %vm223_vm2, %v752_v47 }
  0xbc   : > { %505 = vrot.lane.b32.xlu0 %v1292_v44, %s1534_s27  ;;  %529 = vrot.lane.b32.xlu1 %v1296_v45, %s1535_s28 }
  0xbe   : > { %v836_v50 = vpop.permute.xlu1 %835  ;;  %v812_v51 = vpop.permute.xlu0 %811 }
  0xbf   : > { %838 = vst.msk [vmem:[#allocation2 + $0x19] sm:$0x1] %vm241_vm4, %v836_v50  ;;  %814 = vst.msk [vmem:[#allocation2 + $0x18] sm:$0x1] %vm241_vm4, %v812_v51 }
  0xc0   : > { %553 = vrot.lane.b32.xlu0 %v1300_v48, %s1535_s28  ;;  %577 = vrot.lane.b32.xlu1 %v1304_v49, %s1535_s28 }
  0xc2   : > { %v860_v54 = vpop.permute.xlu0 %859  ;;  %v422_v55 = vpop.permute.xlu1 %421 }
  0xc3   : > { %862 = vst.msk [vmem:[#allocation2 + $0x1a] sm:$0x1] %vm241_vm4, %v860_v54 }
  0xc4   : > { %424 = vst.msk [vmem:[#allocation2 + $0x8] sm:$0x1] %vm214_vm1, %v422_v55  ;;  %601 = vrot.lane.b32.xlu0 %v1308_v52, %s1531_s24  ;;  %229 = vrot.lane.b32.xlu1 %v1225_v53, %s1532_s25 }
  0xc6   : > { %v512_v58 = vpop.permute.xlu0 %511  ;;  %v536_v59 = vpop.permute.xlu1 %535 }
  0xc7   : > { %514 = vst.msk [vmem:[#allocation2 + $0xc] sm:$0x1] %vm214_vm1, %v512_v58  ;;  %538 = vst.msk [vmem:[#allocation2 + $0xd] sm:$0x1] %vm214_vm1, %v536_v59 }
  0xc8   : > { %259 = vrot.lane.b32.xlu0 %v1237_v56, %s1532_s25  ;;  %287 = vrot.lane.b32.xlu1 %v1249_v57, %s1532_s25 }
  0xca   : > { %v560_v60 = vpop.permute.xlu0 %559  ;;  %v584_v61 = vpop.permute.xlu1 %583  ;;  %v870_v62 = vld [vmem:[#allocation2 + $0x18] sm:$0x7] }
  0xcb   : > { %562 = vst.msk [vmem:[#allocation2 + $0xe] sm:$0x1] %vm214_vm1, %v560_v60  ;;  %586 = vst.msk [vmem:[#allocation2 + $0xf] sm:$0x1] %vm214_vm1, %v584_v61  ;;  %1374 = vmatprep.subr.msk.mxu0 %vm908_vm5, %v870_v62  ;;  %1388 = vmatprep.subr.msk.mxu1 %vm908_vm5, %v870_v62 }
  0xcc   : > { %1375 = vmatpush3.msk.msra.mxu0 %vm908_vm5, %v870_v62  ;;  %1392 = vmatpush3.msk.msra.mxu1 %vm908_vm5, %v870_v62 }
  0xcd   : > { %313 = vrot.lane.b32.xlu0 %v1254_v63, %s1533_s26  ;;  %337 = vrot.lane.b32.xlu1 %v1258_v0, %s1533_s26 }
  0xce   : > { %v620_v1 = vpop.permute.xlu0 %619  ;;  %v644_v2 = vpop.permute.xlu1 %643 }
  0xcf   : > { %622 = vst.msk [vmem:[#allocation2 + $0x10] sm:$0x1] %vm232_vm3, %v620_v1  ;;  %646 = vst.msk [vmem:[#allocation2 + $0x11] sm:$0x1] %vm232_vm3, %v644_v2 }
  0xd1   : > { %361 = vrot.lane.b32.xlu0 %v1262_v3, %s1533_s26  ;;  %385 = vrot.lane.b32.xlu1 %v1265_v4, %s1528_s14 }
  0xd2   : > { %v664_v5 = vpop.permute.xlu0 %663  ;;  %v686_v6 = vpop.permute.xlu1 %685 }
  0xd3   : > { %666 = vst.msk [vmem:[#allocation2 + $0x12] sm:$0x1] %vm232_vm3, %v664_v5  ;;  %688 = vst.msk [vmem:[#allocation2 + $0x13] sm:$0x1] %vm232_vm3, %v686_v6 }
  0xd5   : > { %409 = vrot.lane.b32.xlu0 %v1269_v7, %s1528_s14  ;;  %238 = vrot.lane.b32.xlu1 %v1228_v8, %s1534_s27 }
  0xd6   : > { %v708_v9 = vpop.permute.xlu0 %707  ;;  %v734_v10 = vpop.permute.xlu1 %733 }
  0xd7   : > { %710 = vst.msk [vmem:[#allocation2 + $0x14] sm:$0x1] %vm232_vm3, %v708_v9  ;;  %736 = vst.msk [vmem:[#allocation2 + $0x15] sm:$0x1] %vm232_vm3, %v734_v10 }
  0xd9   : > { %267 = vrot.lane.b32.xlu0 %v1240_v11, %s1534_s27  ;;  %295 = vrot.lane.b32.xlu1 %v1252_v12, %s1534_s27 }
  0xda   : > { %v758_v13 = vpop.permute.xlu0 %757  ;;  %v782_v14 = vpop.permute.xlu1 %781 }
  0xdb   : > { %760 = vst.msk [vmem:[#allocation2 + $0x16] sm:$0x1] %vm232_vm3, %v758_v13  ;;  %784 = vst.msk [vmem:[#allocation2 + $0x17] sm:$0x1] %vm232_vm3, %v782_v14 }
  0xdd   : > { %319 = vrot.lane.b32.xlu0 %v1255_v15, %s1535_s28  ;;  %343 = vrot.lane.b32.xlu1 %v1259_v16, %s1535_s28 }
  0xde   : > { %v428_v17 = vpop.permute.xlu0 %427  ;;  %v448_v18 = vpop.permute.xlu1 %447 }
  0xdf   : > { %430 = vst.msk [vmem:[#allocation2 + $0x8] sm:$0x1] %vm223_vm2, %v428_v17  ;;  %450 = vst.msk [vmem:[#allocation2 + $0x9] sm:$0x1] %vm223_vm2, %v448_v18 }
  0xe1   : > { %367 = vrot.lane.b32.xlu0 %v1263_v19, %s1535_s28  ;;  %391 = vrot.lane.b32.xlu1 %v1266_v20, %s1531_s24 }
  0xe2   : > { %v470_v23 = vpop.permute.xlu0 %469  ;;  %v492_v24 = vpop.permute.xlu1 %491 }
  0xe3   : > { %472 = vst.msk [vmem:[#allocation2 + $0xa] sm:$0x1] %vm223_vm2, %v470_v23  ;;  %494 = vst.msk [vmem:[#allocation2 + $0xb] sm:$0x1] %vm223_vm2, %v492_v24 }
  0xe5   : > { %415 = vrot.lane.b32.xlu0 %v1270_v25, %s1531_s24  ;;  %877 = vperm.xlu1 %1466, %v871_v26  }
  0xe6   : > { %v518_v28 = vpop.permute.xlu0 %517  ;;  %v542_v29 = vpop.permute.xlu1 %541 }
  0xe7   : > { %520 = vst.msk [vmem:[#allocation2 + $0xc] sm:$0x1] %vm223_vm2, %v518_v28  ;;  %544 = vst.msk [vmem:[#allocation2 + $0xd] sm:$0x1] %vm223_vm2, %v542_v29  ;;  %v866_v28 = vld [vmem:[%s1995_s1 + $0x18] sm:$0xff] }
  0xe9   : > { %887 = vperm.xlu1 %1466, %v873_v30   ;;  %882 = vperm.xlu0 %1467, %v872_v31  }
  0xea   : > { %v566_v32 = vpop.permute.xlu0 %565  ;;  %v590_v33 = vpop.permute.xlu1 %589 }
  0xeb   : > { %568 = vst.msk [vmem:[#allocation2 + $0xe] sm:$0x1] %vm223_vm2, %v566_v32  ;;  %592 = vst.msk [vmem:[#allocation2 + $0xf] sm:$0x1] %vm223_vm2, %v590_v33 }
  0xed   : > { %892 = vperm.xlu1 %1466, %v874_v34  }
  0xee   : > { %v626_v35 = vpop.permute.xlu0 %625  ;;  %v650_v36 = vpop.permute.xlu1 %649 }
  0xef   : > { %628 = vst.msk [vmem:[#allocation2 + $0x10] sm:$0x1] %vm241_vm4, %v626_v35  ;;  %652 = vst.msk [vmem:[#allocation2 + $0x11] sm:$0x1] %vm241_vm4, %v650_v36 }
  0xf2   : > { %v672_v37 = vpop.permute.xlu0 %671  ;;  %v694_v38 = vpop.permute.xlu1 %693 }
  0xf3   : > { %674 = vst.msk [vmem:[#allocation2 + $0x12] sm:$0x1] %vm241_vm4, %v672_v37  ;;  %696 = vst.msk [vmem:[#allocation2 + $0x13] sm:$0x1] %vm241_vm4, %v694_v38 }
  0xf6   : > { %v716_v39 = vpop.permute.xlu0 %715  ;;  %v740_v40 = vpop.permute.xlu1 %739 }
  0xf7   : > { %718 = vst.msk [vmem:[#allocation2 + $0x14] sm:$0x1] %vm241_vm4, %v716_v39  ;;  %742 = vst.msk [vmem:[#allocation2 + $0x15] sm:$0x1] %vm241_vm4, %v740_v40 }
  0xfa   : > { %v764_v41 = vpop.permute.xlu0 %763  ;;  %v788_v42 = vpop.permute.xlu1 %787 }
  0xfb   : > { %766 = vst.msk [vmem:[#allocation2 + $0x16] sm:$0x1] %vm241_vm4, %v764_v41  ;;  %790 = vst.msk [vmem:[#allocation2 + $0x17] sm:$0x1] %vm241_vm4, %v788_v42 }
  0xfe   : > { %v302_v43 = vpop.permute.xlu0 %301  ;;  %v326_v44 = vpop.permute.xlu1 %325 }
  0xff   : > { %304 = vst.msk [vmem:[#allocation2 + $0x3] sm:$0x1] %vm214_vm1, %v302_v43  ;;  %328 = vst.msk [vmem:[#allocation2 + $0x4] sm:$0x1] %vm214_vm1, %v326_v44 }
 0x102   : > { %v350_v45 = vpop.permute.xlu0 %349  ;;  %v869_v46 = vld [vmem:[#allocation2 + $0x10] sm:$0xff]  ;;  %v374_v47 = vpop.permute.xlu1 %373 }
 0x103   : > { %352 = vst.msk [vmem:[#allocation2 + $0x5] sm:$0x1] %vm214_vm1, %v350_v45  ;;  %1376 = vmatprep.subr.mxu0 %v869_v46  ;;  %1389 = vmatprep.subr.mxu1 %v869_v46  ;;  %376 = vst.msk [vmem:[#allocation2 + $0x6] sm:$0x1] %vm214_vm1, %v374_v47 }
 0x104   : > { %1377 = vmatpush3.msra.mxu0 %v869_v46  ;;  %1393 = vmatpush3.msra.mxu1 %v869_v46 }
 0x106   : > { %v398_v48 = vpop.permute.xlu0 %397  ;;  %v434_v49 = vpop.permute.xlu1 %433 }
 0x107   : > { %400 = vst.msk [vmem:[#allocation2 + $0x7] sm:$0x1] %vm214_vm1, %v398_v48 }
 0x108   : > { %436 = vst.msk [vmem:[#allocation2 + $0x8] sm:$0x1] %vm232_vm3, %v434_v49  ;;  %v1015_v49 = vld [vmem:[%s1611_s6 + $0x8] sm:$0xff] }
 0x10a   : > { %v454_v50 = vpop.permute.xlu0 %453  ;;  %v476_v51 = vpop.permute.xlu1 %475 }
 0x10b   : > { %456 = vst.msk [vmem:[#allocation2 + $0x9] sm:$0x1] %vm232_vm3, %v454_v50  ;;  %478 = vst.msk [vmem:[#allocation2 + $0xa] sm:$0x1] %vm232_vm3, %v476_v51  ;;  %v1014_v51 = vld [vmem:[%s1611_s6] sm:$0xff] }
 0x10e   : > { %v498_v52 = vpop.permute.xlu0 %497  ;;  %v524_v53 = vpop.permute.xlu1 %523 }
 0x10f   : > { %500 = vst.msk [vmem:[#allocation2 + $0xb] sm:$0x1] %vm232_vm3, %v498_v52  ;;  %526 = vst.msk [vmem:[#allocation2 + $0xc] sm:$0x1] %vm232_vm3, %v524_v53 }
 0x112   : > { %v548_v54 = vpop.permute.xlu0 %547  ;;  %v572_v55 = vpop.permute.xlu1 %571 }
 0x113   : > { %550 = vst.msk [vmem:[#allocation2 + $0xd] sm:$0x1] %vm232_vm3, %v548_v54  ;;  %574 = vst.msk [vmem:[#allocation2 + $0xe] sm:$0x1] %vm232_vm3, %v572_v55  ;;  %v1016_v55 = vld [vmem:[%s1611_s6 + $0x10] sm:$0xff] }
 0x116   : > { %v596_v56 = vpop.permute.xlu0 %595  ;;  %v221_v57 = vpop.permute.xlu1 %220 }
 0x117   : > { %598 = vst.msk [vmem:[#allocation2 + $0xf] sm:$0x1] %vm232_vm3, %v596_v56 }
 0x118   : > { %224 = vst.msk [vmem:[#allocation2] sm:$0x1] %vm223_vm2, %v221_v57 }
 0x11a   : > { %v252_v58 = vpop.permute.xlu0 %251  ;;  %v280_v59 = vpop.permute.xlu1 %279 }
 0x11b   : > { %254 = vst.msk [vmem:[#allocation2 + $0x1] sm:$0x1] %vm223_vm2, %v252_v58  ;;  %282 = vst.msk [vmem:[#allocation2 + $0x2] sm:$0x1] %vm223_vm2, %v280_v59  ;;  %v1017_v58 = vld [vmem:[%s1611_s6 + $0x18] sm:$0xff] }
 0x11e   : > { %v308_v60 = vpop.permute.xlu0 %307  ;;  %v332_v61 = vpop.permute.xlu1 %331 }
 0x11f   : > { %310 = vst.msk [vmem:[#allocation2 + $0x3] sm:$0x1] %vm223_vm2, %v308_v60  ;;  %334 = vst.msk [vmem:[#allocation2 + $0x4] sm:$0x1] %vm223_vm2, %v332_v61 }
 0x122   : > { %v356_v62 = vpop.permute.xlu0 %355  ;;  %v380_v63 = vpop.permute.xlu1 %379 }
 0x123   : > { %358 = vst.msk [vmem:[#allocation2 + $0x5] sm:$0x1] %vm223_vm2, %v356_v62  ;;  %382 = vst.msk [vmem:[#allocation2 + $0x6] sm:$0x1] %vm223_vm2, %v380_v63 }
 0x126   : > { %v404_v0 = vpop.permute.xlu0 %403  ;;  %v440_v1 = vpop.permute.xlu1 %439 }
 0x127   : > { %406 = vst.msk [vmem:[#allocation2 + $0x7] sm:$0x1] %vm223_vm2, %v404_v0 }
 0x128   : > { %442 = vst.msk [vmem:[#allocation2 + $0x8] sm:$0x1] %vm241_vm4, %v440_v1 }
 0x12a   : > { %v462_v2 = vpop.permute.xlu0 %461  ;;  %v484_v3 = vpop.permute.xlu1 %483 }
 0x12b   : > { %464 = vst.msk [vmem:[#allocation2 + $0x9] sm:$0x1] %vm241_vm4, %v462_v2  ;;  %486 = vst.msk [vmem:[#allocation2 + $0xa] sm:$0x1] %vm241_vm4, %v484_v3 }
 0x12e   : > { %v506_v4 = vpop.permute.xlu0 %505  ;;  %v530_v5 = vpop.permute.xlu1 %529 }
 0x12f   : > { %508 = vst.msk [vmem:[#allocation2 + $0xb] sm:$0x1] %vm241_vm4, %v506_v4  ;;  %532 = vst.msk [vmem:[#allocation2 + $0xc] sm:$0x1] %vm241_vm4, %v530_v5 }
 0x132   : > { %v554_v6 = vpop.permute.xlu0 %553  ;;  %v578_v7 = vpop.permute.xlu1 %577 }
 0x133   : > { %556 = vst.msk [vmem:[#allocation2 + $0xd] sm:$0x1] %vm241_vm4, %v554_v6  ;;  %580 = vst.msk [vmem:[#allocation2 + $0xe] sm:$0x1] %vm241_vm4, %v578_v7 }
 0x136   : > { %v602_v8 = vpop.permute.xlu0 %601  ;;  %v230_v9 = vpop.permute.xlu1 %229 }
 0x137   : > { %604 = vst.msk [vmem:[#allocation2 + $0xf] sm:$0x1] %vm241_vm4, %v602_v8 }
 0x138   : > { %233 = vst.msk [vmem:[#allocation2] sm:$0x1] %vm232_vm3, %v230_v9 }
 0x13a   : > { %v260_v10 = vpop.permute.xlu0 %259  ;;  %v288_v11 = vpop.permute.xlu1 %287 }
 0x13b   : > { %262 = vst.msk [vmem:[#allocation2 + $0x1] sm:$0x1] %vm232_vm3, %v260_v10  ;;  %290 = vst.msk [vmem:[#allocation2 + $0x2] sm:$0x1] %vm232_vm3, %v288_v11 }
 0x13e   : > { %v868_v12 = vld [vmem:[#allocation2 + $0x8] sm:$0xff] }
 0x13f   : > { %v314_v13 = vpop.permute.xlu0 %313  ;;  %1378 = vmatprep.subr.mxu0 %v868_v12  ;;  %1390 = vmatprep.subr.mxu1 %v868_v12  ;;  %v338_v14 = vpop.permute.xlu1 %337 }
 0x140   : > { %316 = vst.msk [vmem:[#allocation2 + $0x3] sm:$0x1] %vm232_vm3, %v314_v13  ;;  %1379 = vmatpush3.msra.mxu0 %v868_v12  ;;  %1394 = vmatpush3.msra.mxu1 %v868_v12  ;;  %340 = vst.msk [vmem:[#allocation2 + $0x4] sm:$0x1] %vm232_vm3, %v338_v14 }
 0x143   : > { %v362_v15 = vpop.permute.xlu0 %361  ;;  %v386_v16 = vpop.permute.xlu1 %385 }
 0x144   : > { %364 = vst.msk [vmem:[#allocation2 + $0x5] sm:$0x1] %vm232_vm3, %v362_v15  ;;  %388 = vst.msk [vmem:[#allocation2 + $0x6] sm:$0x1] %vm232_vm3, %v386_v16 }
 0x147   : > { %v410_v17 = vpop.permute.xlu0 %409  ;;  %v239_v18 = vpop.permute.xlu1 %238 }
 0x148   : > { %412 = vst.msk [vmem:[#allocation2 + $0x7] sm:$0x1] %vm232_vm3, %v410_v17 }
 0x149   : > { %242 = vst.msk [vmem:[#allocation2] sm:$0x1] %vm241_vm4, %v239_v18 }
 0x14b   : > { %v268_v19 = vpop.permute.xlu0 %267  ;;  %v296_v20 = vpop.permute.xlu1 %295 }
 0x14c   : > { %270 = vst.msk [vmem:[#allocation2 + $0x1] sm:$0x1] %vm241_vm4, %v268_v19  ;;  %298 = vst.msk [vmem:[#allocation2 + $0x2] sm:$0x1] %vm241_vm4, %v296_v20 }
 0x14f   : > { %v320_v21 = vpop.permute.xlu0 %319  ;;  %v344_v22 = vpop.permute.xlu1 %343 }
 0x150   : > { %322 = vst.msk [vmem:[#allocation2 + $0x3] sm:$0x1] %vm241_vm4, %v320_v21  ;;  %346 = vst.msk [vmem:[#allocation2 + $0x4] sm:$0x1] %vm241_vm4, %v344_v22 }
 0x153   : > { %v368_v23 = vpop.permute.xlu0 %367  ;;  %v392_v24 = vpop.permute.xlu1 %391 }
 0x154   : > { %370 = vst.msk [vmem:[#allocation2 + $0x5] sm:$0x1] %vm241_vm4, %v368_v23  ;;  %394 = vst.msk [vmem:[#allocation2 + $0x6] sm:$0x1] %vm241_vm4, %v392_v24 }
 0x157   : > { %v416_v25 = vpop.permute.xlu0 %415 }
 0x158   : > { %418 = vst.msk [vmem:[#allocation2 + $0x7] sm:$0x1] %vm241_vm4, %v416_v25 }
 0x15f   : > { %v867_v26 = vld [vmem:[#allocation2] sm:$0xff] }
 0x160   : > { %1380 = vmatprep.subr.mxu0 %v867_v26  ;;  %1391 = vmatprep.subr.mxu1 %v867_v26  ;;  %v878_v29 = vpop.permute.xlu1 %877 }
 0x161   : > { %1381 = vmatpush3.msra.mxu0 %v867_v26  ;;  %1395 = vmatpush3.msra.mxu1 %v867_v26 }
 0x162   : > { %1383 = vmatmul.mubr.msk.f32.vlgmr.msra.gmra.mxu0 %vm895_vm6, %v864_v27  ;;  %1386 = vmatmul.mubr.msk.f32.vlgmr.msra.gmra.mxu1 %vm895_vm6, %v866_v28 }
 0x164   : > { %v888_v30 = vpop.permute.xlu1 %887  ;;  %v883_v31 = vpop.permute.xlu0 %882 }
 0x168   : > { %v893_v40 = vpop.permute.xlu1 %892 }
 0x222   : > { %v1384_v32 = vpop.f32.mrf.mxu0  ;;  %v1387_v33 = vpop.f32.mrf.mxu1 }
 0x223   : > { %v984_v34 = vadd.f32 %v1384_v32, %v883_v31  ;;  %v994_v43 = vadd.f32 %v1387_v33, %v893_v40 }
 0x224   : > { %v978_v35 = vpop.f32.mrf.mxu0  ;;  %v988_v36 = vpop.f32.mrf.mxu1 }
 0x225   : > { %v998_v37 = vmax.f32 %v984_v34, 0.0  ;;  %v979_v38 = vadd.f32 %v978_v35, %v878_v29  ;;  %v989_v39 = vadd.f32 %v988_v36, %v888_v30  ;;  %v1000_v46 = vmax.f32 %v994_v43, 0.0 }
 0x227   : > { %v997_v41 = vmax.f32 %v979_v38, 0.0  ;;  %v1005_v42 = vsel %vm1001_vm7, %v998_v37, 0.0  ;;  %v999_v44 = vmax.f32 %v989_v39, 0.0  ;;  %v1011_v48 = vsel %vm1001_vm7, %v1000_v46, 0.0 }
 0x228   : > { %1006 = vadd.xlane.f32.xlu1 %v1005_v42 }
 0x229   : > { %v1002_v45 = vsel %vm1001_vm7, %v997_v41, 0.0  ;;  %v1008_v47 = vsel %vm1001_vm7, %v999_v44, 0.0 }
 0x22a   : > { %1003 = vadd.xlane.f32.xlu0 %v1002_v45 }
 0x22e   : > { %1009 = vadd.xlane.f32.xlu0 %v1008_v47 }
 0x232   : > { %1012 = vadd.xlane.f32.xlu0 %v1011_v48 }
 0x2b1   : > { %v1007_v50 = vpop.xlane.xlu1 %1006 }
 0x2b2   : > { %v1019_v52 = vadd.f32 %v1015_v49, %v1007_v50 }
 0x2b3   : > { %v1004_v53 = vpop.xlane.xlu0 %1003 }
 0x2b4   : > { %1024 = vst.msk [vmem:[%s1611_s6 + $0x8] sm:$0xff] %vm1022_vm8, %v1019_v52  ;;  %v1018_v54 = vadd.f32 %v1014_v51, %v1004_v53 }
 0x2b6   : > { %1023 = vst.msk [vmem:[%s1611_s6] sm:$0xff] %vm1022_vm8, %v1018_v54 }
 0x2b7   : > { %v1010_v56 = vpop.xlane.xlu0 %1009 }
 0x2b8   : > { %v1020_v57 = vadd.f32 %v1016_v55, %v1010_v56 }
 0x2ba   : > { %1025 = vst.msk [vmem:[%s1611_s6 + $0x10] sm:$0xff] %vm1022_vm8, %v1020_v57 }
 0x2bb   : > { %v1013_v59 = vpop.xlane.xlu0 %1012 }
 0x2bc   : > { %v1021_v60 = vadd.f32 %v1017_v58, %v1013_v59 }
 0x2be   : > { %1026 = vst.msk [vmem:[%s1611_s6 + $0x18] sm:$0xff] %vm1022_vm8, %v1021_v60 }
 0x2bf PF: > { %s13_s18 = sadd.s32 1, %s1522_s18   ;;  %s1998_s12 = smov %s1510_s15 }
 0x2c0   : > { %p10_p9 = scmp.ge.s32.totalorder %s13_s18, 10   ;;  %s1999_s13 = smov %s1514_s16 }
 0x2c1   : > { %s2000_s14 = smov %s1518_s17  ;;  %s2001_s15 = smov %s2005_s19 }
 0x2c2   : > { %s2002_s16 = smov %s2009_s20  ;;  %s2003_s17 = smov %s2013_s21 }
 0x2c3   :  { %12 = sbr.rel (!%p10_p9) target bundleno = 4 (0x4), region = 84 }

</bundles_post_ra>
